<compile_context>
chip_gen: v6e
topology: v6e:2x2x1
jax: 0.10.0
libtpu: 0.0.40
codegen_flags: <defaults>
</compile_context>

<pallas_src>
import functools

import jax
import jax.numpy as jnp
from jax.experimental import pallas as pl
from jax.experimental.pallas import tpu as pltpu


# Matmul-operand dtype for the MXU projections (accumulation is always f32).
_MXU_DTYPE = jnp.bfloat16


# ----------------------------------------------------------------------------
# Fused kernel: encoder -> L-layer LSTM -> decoder.
# grid = (num_layers,), sequential ("arbitrary").
# Scratch:
#   x_buf     (T*B, H)  bf16: current layer's input sequence, overwritten in
#                             place with that layer's outputs (feeds next layer
#                             and, after the last layer, the decoder).
#   gproj_buf (T*B, 4H) f32:  hoisted x @ W_ih^T + b for the whole layer.
# ----------------------------------------------------------------------------
def _heart_rnn_kernel(x_ref, enc_wt_ref, enc_b_ref,
                      wih_ref, whh_ref, b_ref, h0_ref, c0_ref,
                      dec_wt_ref, dec_b_ref,
                      dec_ref, hn_ref, cn_ref,
                      x_buf, gproj_buf,
                      *, seq_len, batch, hid):
    l = pl.program_id(0)
    num_layers = pl.num_programs(0)

    # ---- layer-0 prologue: fused encoder  emb = x @ W_enc^T + b_enc --------
    # x_buf is bf16: it is only ever consumed as an MXU operand (which would
    # be cast to bf16 anyway), so numerics are unchanged.
    @pl.when(l == 0)
    def _():
        x_buf[...] = (
            jnp.dot(x_ref[...].astype(_MXU_DTYPE), enc_wt_ref[...],
                    preferred_element_type=jnp.float32)
            + enc_b_ref[...]).astype(x_buf.dtype)

    # ---- hoisted input projection: one (T*B, 4H) matmul off the serial path
    # TODO(synk): for large T, time-chunk this inside a fori_loop so the f32
    # (T*B, 4H) buffer never materializes in full (v7x VMEM is only 64 MiB).
    gproj_buf[...] = (
        jnp.dot(x_buf[...], wih_ref[0], preferred_element_type=jnp.float32)
        + b_ref[0])

    # Recurrent weights stay f32: the per-step matmul is tiny and keeping it
    # f32 avoids compounding bf16 rounding through T timesteps (closer parity
    # with PyTorch's f32 LSTM).
    whh = whh_ref[0]       # (H, 4H) f32, loaded once per layer
    h = h0_ref[0]          # (B, H) f32, loop-carried value (no scratch store)
    c = c0_ref[0]          # (B, H) f32

    # Batch the per-step layer-output stores into full sublane tiles so the
    # serial time loop never issues masked read-modify-write stores.
    # bf16 packs 16 rows per (sublane x lane) tile.
    tile_rows = 16
    if batch <= tile_rows and tile_rows % batch == 0:
        store_rows = tile_rows
    else:
        store_rows = batch
    pending = []        # h values (f32) awaiting a tile-aligned store
    pending_start = 0   # first timestep covered by `pending`

    # T is small & static -> full unroll gives the scheduler cross-timestep
    # visibility and keeps all slice offsets static.
    # TODO(synk): for large T switch to lax.fori_loop(..., unroll=4..8) to
    # bound vreg live ranges, and wavefront layers with block-diagonal W_hh
    # (256-lane RHS) on v6e/v7x; on v7x additionally shard batch across the
    # two TensorCores and use MRB accumulation for the gproj add.
    for t in range(seq_len):
        # gates = hoisted x-projection[t] + h_prev @ W_hh^T   -> (B, 4H) f32
        pre = (gproj_buf[t * batch:(t + 1) * batch, :]
               + jnp.dot(h, whh, preferred_element_type=jnp.float32))
        # Full-(B,4H)-width nonlinearities (2 EUP passes instead of 4), then
        # cheap static lane slices. PyTorch LSTM gate order: i, f, g, o.
        sg = jax.nn.sigmoid(pre)
        th = jnp.tanh(pre)
        i_g = sg[:, 0 * hid:1 * hid]
        f_g = sg[:, 1 * hid:2 * hid]
        g_g = th[:, 2 * hid:3 * hid]
        o_g = sg[:, 3 * hid:4 * hid]
        c = f_g * c + i_g * g_g
        h = o_g * jnp.tanh(c)

        pending.append(h)
        if (len(pending) * batch >= store_rows) or (t == seq_len - 1):
            blk = pending[0] if len(pending) == 1 else jnp.concatenate(
                pending, axis=0)
            x_buf[pending_start * batch:(t + 1) * batch, :] = blk.astype(
                x_buf.dtype)
            pending = []
            pending_start = t + 1

    hn_ref[0] = h
    cn_ref[0] = c

    # ---- last-layer epilogue: fused decoder (lane-dense, d_out padded) -----
    # NOTE: dec_ref's index_map is constant over the layer grid, so this
    # output block stays resident in VMEM across all grid steps; the write
    # below on the last step is the value that reaches HBM.
    @pl.when(l == num_layers - 1)
    def _():
        dec_ref[...] = (
            jnp.dot(x_buf[...], dec_wt_ref[...],
                    preferred_element_type=jnp.float32)
            + dec_b_ref[...])


# ----------------------------------------------------------------------------
# One-time parameter re-layout (do NOT redo per forward call):
#   - transpose weights so the kernel does plain x @ W,
#   - fuse the 4 gates along the last (lane) dim: (L, H_in, 4H) / (L, H, 4H),
#   - fold b_ih + b_hh,
#   - pre-cast projection weights to bf16 (MXU operands); the recurrent W_hh
#     and all biases stay f32,
#   - zero-pad the decoder to a lane-dense (H, 128k) / (1, 128k) layout.
# ----------------------------------------------------------------------------
def prepare_params(raw_params, mxu_dtype=_MXU_DTYPE):
    enc_w, enc_b, w_ih, w_hh, b_ih, b_hh, dec_w, dec_b = raw_params
    num_layers, four_h, _ = w_ih.shape
    d_out, hid = dec_w.shape
    d_pad = pl.cdiv(d_out, 128) * 128            # lane-dense decoder output

    enc_wt = enc_w.T.astype(mxu_dtype)                           # (E, H)
    wih_t = jnp.transpose(w_ih, (0, 2, 1)).astype(mxu_dtype)     # (L, H_in, 4H)
    whh_t = jnp.transpose(w_hh, (0, 2, 1)).astype(jnp.float32)   # (L, H, 4H) f32
    b_g = (b_ih + b_hh).reshape(num_layers, 1, four_h).astype(jnp.float32)

    dec_wt = jnp.zeros((hid, d_pad), mxu_dtype).at[:, :d_out].set(
        dec_w.T.astype(mxu_dtype))                               # (H, d_pad)
    dec_bp = jnp.zeros((1, d_pad), jnp.float32).at[:, :d_out].set(
        dec_b.reshape(1, -1).astype(jnp.float32))                # (1, d_pad)

    return (enc_wt, enc_b.reshape(1, -1).astype(jnp.float32),
            wih_t, whh_t, b_g, dec_wt, dec_bp, int(d_out))


# ----------------------------------------------------------------------------
# Full HeartRNN forward (dropout = identity in eval mode).
# ----------------------------------------------------------------------------
def heart_rnn_forward(x, hidden, prep_params):
    enc_wt, enc_b, wih_t, whh_t, b_g, dec_wt, dec_b, d_out = prep_params
    T, B, E = x.shape
    L, h_in, four_h = wih_t.shape
    H = four_h // 4
    d_pad = dec_wt.shape[1]
    h0, c0 = hidden

    # x_buf is reused as every layer's input/output buffer -> requires
    # rnn_inp_size == rnn_hid_size (the same constraint the PyTorch module's
    # emb.view(-1, B, rnn_hid_size) imposes). Fail loudly on mismatch.
    assert h_in == H, f"rnn_inp_size ({h_in}) must equal rnn_hid_size ({H})"
    assert whh_t.shape == (L, H, four_h)
    assert h0.shape == (L, B, H) and c0.shape == (L, B, H)

    x_flat = x.reshape(T * B, E)   # time-major flatten, same as module's .view

    kernel = functools.partial(_heart_rnn_kernel, seq_len=T, batch=B, hid=H)

    dec_flat, hn, cn = pl.pallas_call(
        kernel,
        out_shape=(
            jax.ShapeDtypeStruct((T * B, d_pad), jnp.float32),  # decoded (padded)
            jax.ShapeDtypeStruct((L, B, H), jnp.float32),       # h_n
            jax.ShapeDtypeStruct((L, B, H), jnp.float32),       # c_n
        ),
        grid_spec=pltpu.PrefetchScalarGridSpec(
            num_scalar_prefetch=0,
            grid=(L,),
            in_specs=[
                pl.BlockSpec((T * B, E), lambda l: (0, 0)),            # x (resident)
                pl.BlockSpec((E, H), lambda l: (0, 0)),                # enc W^T
                pl.BlockSpec((1, H), lambda l: (0, 0)),                # enc b
                pl.BlockSpec((1, h_in, four_h), lambda l: (l, 0, 0)),  # W_ih^T
                pl.BlockSpec((1, H, four_h), lambda l: (l, 0, 0)),     # W_hh^T (f32)
                pl.BlockSpec((1, 1, four_h), lambda l: (l, 0, 0)),     # b_ih + b_hh
                pl.BlockSpec((1, B, H), lambda l: (l, 0, 0)),          # h0
                pl.BlockSpec((1, B, H), lambda l: (l, 0, 0)),          # c0
                pl.BlockSpec((H, d_pad), lambda l: (0, 0)),            # dec W^T (padded)
                pl.BlockSpec((1, d_pad), lambda l: (0, 0)),            # dec b  (padded)
            ],
            out_specs=[
                pl.BlockSpec((T * B, d_pad), lambda l: (0, 0)),        # decoded
                pl.BlockSpec((1, B, H), lambda l: (l, 0, 0)),          # h_n
                pl.BlockSpec((1, B, H), lambda l: (l, 0, 0)),          # c_n
            ],
            scratch_shapes=[
                pltpu.VMEM((T * B, H), jnp.bfloat16),       # x_buf (bf16)
                pltpu.VMEM((T * B, four_h), jnp.float32),   # hoisted x @ W_ih
            ],
        ),
        # Layers are a true sequential dependency -> "arbitrary".
        # TODO(synk): on v7x with B >= 16, add a leading batch grid axis marked
        # "parallel" (or core_map over a 2-TC mesh) for the second TensorCore.
        compiler_params=pltpu.CompilerParams(
            dimension_semantics=("arbitrary",)),
    )(x_flat, enc_wt, enc_b, wih_t, whh_t, b_g, h0, c0, dec_wt, dec_b)

    decoded = dec_flat[:, :d_out].reshape(T, B, d_out)
    return decoded, (hn, cn)


# ----------------------------------------------------------------------------
# Pure-JAX reference (PyTorch semantics).
# proj_dtype=bfloat16 mirrors the kernel exactly: encoder / input-projection /
# decoder matmul operands in bf16 (f32 accumulation), recurrence in f32.
# proj_dtype=float32 is the plain PyTorch-style f32 reference.
# ----------------------------------------------------------------------------
def heart_rnn_ref(x, hidden, raw_params, proj_dtype=jnp.float32):
    enc_w, enc_b, w_ih, w_hh, b_ih, b_hh, dec_w, dec_b = raw_params
    T, B, E = x.shape
    L, four_h, _ = w_ih.shape
    H = four_h // 4
    h0, c0 = hidden

    def mm(a, bmat, dt):
        return jnp.dot(a.astype(dt), bmat.astype(dt),
                       preferred_element_type=jnp.float32)

    emb = (mm(x.reshape(T * B, E), enc_w.T, proj_dtype)
           + enc_b).reshape(T, B, H)

    layer_in = emb
    hs, cs = [], []
    for l in range(L):
        h, c = h0[l], c0[l]
        outs = []
        for t in range(T):
            gates = (mm(layer_in[t], w_ih[l].T, proj_dtype) + b_ih[l]
                     + mm(h, w_hh[l].T, jnp.float32) + b_hh[l])
            i = jax.nn.sigmoid(gates[:, 0 * H:1 * H])
            f = jax.nn.sigmoid(gates[:, 1 * H:2 * H])
            g = jnp.tanh(gates[:, 2 * H:3 * H])
            o = jax.nn.sigmoid(gates[:, 3 * H:4 * H])
            c = f * c + i * g
            h = o * jnp.tanh(c)
            outs.append(h)
        layer_in = jnp.stack(outs)
        hs.append(h)
        cs.append(c)

    dec = (mm(layer_in.reshape(T * B, H), dec_w.T, proj_dtype)
           + dec_b).reshape(T, B, -1)
    return dec, (jnp.stack(hs), jnp.stack(cs))


if __name__ == "__main__":
    # Small shapes consistent with the module's forward.
    T, B = 8, 2                 # seq_len, batch
    ENC_IN = 4                  # enc_inp_size (feature dim)
    RNN_INP = RNN_HID = 32      # must be equal (see module's emb.view)
    DEC_OUT = 4                 # dec_out_size
    L = 2                       # num_layers

    key = jax.random.PRNGKey(0)
    ks = jax.random.split(key, 8)
    initrange = 0.1
    stdv = 1.0 / (RNN_HID ** 0.5)

    enc_w = jax.random.uniform(ks[0], (RNN_INP, ENC_IN), jnp.float32,
                               -initrange, initrange)
    enc_b = jax.random.uniform(ks[1], (RNN_INP,), jnp.float32,
                               -1.0 / (ENC_IN ** 0.5), 1.0 / (ENC_IN ** 0.5))
    dec_w = jax.random.uniform(ks[2], (DEC_OUT, RNN_HID), jnp.float32,
                               -initrange, initrange)
    dec_b = jnp.zeros((DEC_OUT,), jnp.float32)

    w_ih = jax.random.uniform(ks[3], (L, 4 * RNN_HID, RNN_INP), jnp.float32,
                              -stdv, stdv)
    w_hh = jax.random.uniform(ks[4], (L, 4 * RNN_HID, RNN_HID), jnp.float32,
                              -stdv, stdv)
    b_ih = jax.random.uniform(ks[5], (L, 4 * RNN_HID), jnp.float32, -stdv, stdv)
    b_hh = jax.random.uniform(ks[6], (L, 4 * RNN_HID), jnp.float32, -stdv, stdv)

    raw_params = (enc_w, enc_b, w_ih, w_hh, b_ih, b_hh, dec_w, dec_b)
    prep = prepare_params(raw_params)   # one-time re-layout + bf16 cast

    x = jax.random.normal(ks[7], (T, B, ENC_IN), jnp.float32)
    # init_hidden(bsz): zeros of shape (num_layers, bsz, rnn_hid_size)
    h0 = jnp.zeros((L, B, RNN_HID), jnp.float32)
    c0 = jnp.zeros((L, B, RNN_HID), jnp.float32)

    decoded, (hn, cn) = heart_rnn_forward(x, (h0, c0), prep)
    jax.block_until_ready((decoded, hn, cn))

    assert decoded.shape == (T, B, DEC_OUT)
    assert hn.shape == (L, B, RNN_HID) and cn.shape == (L, B, RNN_HID)

    # Tight check: reference that mirrors the kernel's numerics exactly
    # (bf16 operands for encoder / input projection / decoder, f32 recurrence).
    d_m, (h_m, c_m) = heart_rnn_ref(x, (h0, c0), raw_params,
                                    proj_dtype=_MXU_DTYPE)
    for got, ref in ((decoded, d_m), (hn, h_m), (cn, c_m)):
        err = float(jnp.max(jnp.abs(got - ref)))
        if not err < 2e-3:
            raise AssertionError(
                f"mismatch vs bf16-matched reference, max abs err = {err}")

    # Loose sanity check against the full-f32 PyTorch-semantics reference
    # (absorbs the deliberate bf16-operand drift of the projections).
    d_f32, (h_f32, c_f32) = heart_rnn_ref(x, (h0, c0), raw_params,
                                          proj_dtype=jnp.float32)
    for got, ref in ((decoded, d_f32), (hn, h_f32), (cn, c_f32)):
        err = float(jnp.max(jnp.abs(got - ref)))
        if not err < 5e-2:
            raise AssertionError(
                f"mismatch vs f32 reference, max abs err = {err}")

    print("KERNEL_OK")
</pallas_src>

<mosaic_0001>
module attributes {stable_mosaic.version = 11 : i64} {
  func.func @_heart_rnn_kernel(%arg0: i32, %arg1: memref<16x4xf32, #tpu.memory_space<vmem>>, %arg2: memref<4x32xbf16, #tpu.memory_space<vmem>>, %arg3: memref<1x32xf32, #tpu.memory_space<vmem>>, %arg4: memref<1x32x128xbf16, #tpu.memory_space<vmem>>, %arg5: memref<1x32x128xf32, #tpu.memory_space<vmem>>, %arg6: memref<1x1x128xf32, #tpu.memory_space<vmem>>, %arg7: memref<1x2x32xf32, #tpu.memory_space<vmem>>, %arg8: memref<1x2x32xf32, #tpu.memory_space<vmem>>, %arg9: memref<32x128xbf16, #tpu.memory_space<vmem>>, %arg10: memref<1x128xf32, #tpu.memory_space<vmem>>, %arg11: memref<16x128xf32, #tpu.memory_space<vmem>>, %arg12: memref<1x2x32xf32, #tpu.memory_space<vmem>>, %arg13: memref<1x2x32xf32, #tpu.memory_space<vmem>>, %arg14: memref<16x32xbf16, #tpu.memory_space<vmem>>, %arg15: memref<16x128xf32, #tpu.memory_space<vmem>>) attributes {dimension_semantics = [#tpu.dimension_semantics<arbitrary>], iteration_bounds = array<i64: 2>, scalar_prefetch = 0 : i64, scratch_operands = 2 : i64, tpu.core_type = #tpu.core_type<tc>, window_params = [{pipeline_mode = #tpu.pipeline_mode<synchronous>, transform_indices = @transform_0, window_bounds = array<i64: 16, 4>}, {pipeline_mode = #tpu.pipeline_mode<synchronous>, transform_indices = @transform_1, window_bounds = array<i64: 4, 32>}, {pipeline_mode = #tpu.pipeline_mode<synchronous>, transform_indices = @transform_2, window_bounds = array<i64: 1, 32>}, {transform_indices = @transform_3, window_bounds = array<i64: 1, 32, 128>}, {transform_indices = @transform_4, window_bounds = array<i64: 1, 32, 128>}, {transform_indices = @transform_5, window_bounds = array<i64: 1, 1, 128>}, {transform_indices = @transform_6, window_bounds = array<i64: 1, 2, 32>}, {transform_indices = @transform_7, window_bounds = array<i64: 1, 2, 32>}, {pipeline_mode = #tpu.pipeline_mode<synchronous>, transform_indices = @transform_8, window_bounds = array<i64: 32, 128>}, {pipeline_mode = #tpu.pipeline_mode<synchronous>, transform_indices = @transform_9, window_bounds = array<i64: 1, 128>}, {pipeline_mode = #tpu.pipeline_mode<synchronous>, transform_indices = @transform_10, window_bounds = array<i64: 16, 128>}, {transform_indices = @transform_11, window_bounds = array<i64: 1, 2, 32>}, {transform_indices = @transform_12, window_bounds = array<i64: 1, 2, 32>}]} {
    %c0_i32 = arith.constant 0 : i32
    %0 = arith.cmpi eq, %arg0, %c0_i32 : i32
    %1 = arith.extui %0 : i1 to i32
    %c0_i32_0 = arith.constant 0 : i32
    %2 = arith.cmpi ne, %1, %c0_i32_0 : i32
    scf.if %2 {
      %c0_53 = arith.constant 0 : index
      %c0_54 = arith.constant 0 : index
      %174 = vector.load %arg1[%c0_53, %c0_54] : memref<16x4xf32, #tpu.memory_space<vmem>>, vector<16x4xf32>
      %175 = arith.truncf %174 : vector<16x4xf32> to vector<16x4xbf16>
      %c0_55 = arith.constant 0 : index
      %c0_56 = arith.constant 0 : index
      %176 = vector.load %arg2[%c0_55, %c0_56] : memref<4x32xbf16, #tpu.memory_space<vmem>>, vector<4x32xbf16>
      %cst_57 = arith.constant dense<0.000000e+00> : vector<16x32xf32>
      %177 = tpu.matmul %175, %176, %cst_57 {dimension_numbers = #tpu.dot_dimension_numbers<[1], [0], [0], [1], [0, 0, 1, 1], [], []>} : vector<16x4xbf16>, vector<4x32xbf16>, vector<16x32xf32> -> vector<16x32xf32>
      %c0_58 = arith.constant 0 : index
      %c0_59 = arith.constant 0 : index
      %178 = vector.load %arg3[%c0_58, %c0_59] : memref<1x32xf32, #tpu.memory_space<vmem>>, vector<1x32xf32>
      %179 = vector.broadcast %178 : vector<1x32xf32> to vector<16x32xf32>
      %180 = arith.addf %177, %179 : vector<16x32xf32>
      %181 = arith.truncf %180 : vector<16x32xf32> to vector<16x32xbf16>
      %c0_60 = arith.constant 0 : index
      %c0_61 = arith.constant 0 : index
      %182 = vector.load %arg14[%c0_60, %c0_61] : memref<16x32xbf16, #tpu.memory_space<vmem>>, vector<16x32xbf16>
      tpu.vector_store %arg14[%c0_60, %c0_61], %181 {strides = array<i32>} : memref<16x32xbf16, #tpu.memory_space<vmem>>, vector<16x32xbf16>,
    } else {
    }
    %c0 = arith.constant 0 : index
    %c0_1 = arith.constant 0 : index
    %3 = vector.load %arg14[%c0, %c0_1] : memref<16x32xbf16, #tpu.memory_space<vmem>>, vector<16x32xbf16>
    %c0_2 = arith.constant 0 : index
    %c0_3 = arith.constant 0 : index
    %c0_4 = arith.constant 0 : index
    %4 = vector.load %arg4[%c0_2, %c0_3, %c0_4] : memref<1x32x128xbf16, #tpu.memory_space<vmem>>, vector<1x32x128xbf16>
    %5 = vector.shape_cast %4 : vector<1x32x128xbf16> to vector<32x128xbf16>
    %cst = arith.constant dense<0.000000e+00> : vector<16x128xf32>
    %6 = tpu.matmul %3, %5, %cst {dimension_numbers = #tpu.dot_dimension_numbers<[1], [0], [0], [1], [0, 0, 1, 1], [], []>} : vector<16x32xbf16>, vector<32x128xbf16>, vector<16x128xf32> -> vector<16x128xf32>
    %c0_5 = arith.constant 0 : index
    %c0_6 = arith.constant 0 : index
    %c0_7 = arith.constant 0 : index
    %7 = vector.load %arg6[%c0_5, %c0_6, %c0_7] : memref<1x1x128xf32, #tpu.memory_space<vmem>>, vector<1x1x128xf32>
    %8 = vector.shape_cast %7 : vector<1x1x128xf32> to vector<1x128xf32>
    %9 = vector.broadcast %8 : vector<1x128xf32> to vector<16x128xf32>
    %10 = arith.addf %6, %9 : vector<16x128xf32>
    %c0_8 = arith.constant 0 : index
    %c0_9 = arith.constant 0 : index
    %11 = vector.load %arg15[%c0_8, %c0_9] : memref<16x128xf32, #tpu.memory_space<vmem>>, vector<16x128xf32>
    tpu.vector_store %arg15[%c0_8, %c0_9], %10 {strides = array<i32>} : memref<16x128xf32, #tpu.memory_space<vmem>>, vector<16x128xf32>,
    %c0_10 = arith.constant 0 : index
    %c0_11 = arith.constant 0 : index
    %c0_12 = arith.constant 0 : index
    %12 = vector.load %arg5[%c0_10, %c0_11, %c0_12] : memref<1x32x128xf32, #tpu.memory_space<vmem>>, vector<1x32x128xf32>
    %13 = vector.shape_cast %12 : vector<1x32x128xf32> to vector<32x128xf32>
    %c0_13 = arith.constant 0 : index
    %c0_14 = arith.constant 0 : index
    %c0_15 = arith.constant 0 : index
    %14 = vector.load %arg7[%c0_13, %c0_14, %c0_15] : memref<1x2x32xf32, #tpu.memory_space<vmem>>, vector<1x2x32xf32>
    %15 = vector.shape_cast %14 : vector<1x2x32xf32> to vector<2x32xf32>
    %c0_16 = arith.constant 0 : index
    %c0_17 = arith.constant 0 : index
    %c0_18 = arith.constant 0 : index
    %16 = vector.load %arg8[%c0_16, %c0_17, %c0_18] : memref<1x2x32xf32, #tpu.memory_space<vmem>>, vector<1x2x32xf32>
    %17 = vector.shape_cast %16 : vector<1x2x32xf32> to vector<2x32xf32>
    %c0_19 = arith.constant 0 : index
    %c0_20 = arith.constant 0 : index
    %18 = vector.load %arg15[%c0_19, %c0_20] : memref<16x128xf32, #tpu.memory_space<vmem>>, vector<2x128xf32>
    %cst_21 = arith.constant dense<0.000000e+00> : vector<2x128xf32>
    %19 = tpu.matmul %15, %13, %cst_21 {dimension_numbers = #tpu.dot_dimension_numbers<[1], [0], [0], [1], [0, 0, 1, 1], [], []>} : vector<2x32xf32>, vector<32x128xf32>, vector<2x128xf32> -> vector<2x128xf32>
    %20 = arith.addf %18, %19 : vector<2x128xf32>
    %21 = arith.negf %20 : vector<2x128xf32>
    %22 = math.exp %21 : vector<2x128xf32>
    %cst_22 = arith.constant 1.000000e+00 : f32
    %23 = vector.broadcast %cst_22 : f32 to vector<2x128xf32>
    %24 = arith.addf %23, %22 : vector<2x128xf32>
    %25 = arith.divf %23, %24 : vector<2x128xf32>
    %26 = math.tanh %20 : vector<2x128xf32>
    %27 = vector.extract_strided_slice %25 {offsets = [0, 0], sizes = [2, 32], strides = [1, 1]} : vector<2x128xf32> to vector<2x32xf32>
    %28 = vector.extract_strided_slice %25 {offsets = [0, 32], sizes = [2, 32], strides = [1, 1]} : vector<2x128xf32> to vector<2x32xf32>
    %29 = vector.extract_strided_slice %26 {offsets = [0, 64], sizes = [2, 32], strides = [1, 1]} : vector<2x128xf32> to vector<2x32xf32>
    %30 = vector.extract_strided_slice %25 {offsets = [0, 96], sizes = [2, 32], strides = [1, 1]} : vector<2x128xf32> to vector<2x32xf32>
    %31 = arith.mulf %28, %17 : vector<2x32xf32>
    %32 = arith.mulf %27, %29 : vector<2x32xf32>
    %33 = arith.addf %31, %32 : vector<2x32xf32>
    %34 = math.tanh %33 : vector<2x32xf32>
    %35 = arith.mulf %30, %34 : vector<2x32xf32>
    %c2 = arith.constant 2 : index
    %c0_23 = arith.constant 0 : index
    %36 = vector.load %arg15[%c2, %c0_23] : memref<16x128xf32, #tpu.memory_space<vmem>>, vector<2x128xf32>
    %cst_24 = arith.constant dense<0.000000e+00> : vector<2x128xf32>
    %37 = tpu.matmul %35, %13, %cst_24 {dimension_numbers = #tpu.dot_dimension_numbers<[1], [0], [0], [1], [0, 0, 1, 1], [], []>} : vector<2x32xf32>, vector<32x128xf32>, vector<2x128xf32> -> vector<2x128xf32>
    %38 = arith.addf %36, %37 : vector<2x128xf32>
    %39 = arith.negf %38 : vector<2x128xf32>
    %40 = math.exp %39 : vector<2x128xf32>
    %cst_25 = arith.constant 1.000000e+00 : f32
    %41 = vector.broadcast %cst_25 : f32 to vector<2x128xf32>
    %42 = arith.addf %41, %40 : vector<2x128xf32>
    %43 = arith.divf %41, %42 : vector<2x128xf32>
    %44 = math.tanh %38 : vector<2x128xf32>
    %45 = vector.extract_strided_slice %43 {offsets = [0, 0], sizes = [2, 32], strides = [1, 1]} : vector<2x128xf32> to vector<2x32xf32>
    %46 = vector.extract_strided_slice %43 {offsets = [0, 32], sizes = [2, 32], strides = [1, 1]} : vector<2x128xf32> to vector<2x32xf32>
    %47 = vector.extract_strided_slice %44 {offsets = [0, 64], sizes = [2, 32], strides = [1, 1]} : vector<2x128xf32> to vector<2x32xf32>
    %48 = vector.extract_strided_slice %43 {offsets = [0, 96], sizes = [2, 32], strides = [1, 1]} : vector<2x128xf32> to vector<2x32xf32>
    %49 = arith.mulf %46, %33 : vector<2x32xf32>
    %50 = arith.mulf %45, %47 : vector<2x32xf32>
    %51 = arith.addf %49, %50 : vector<2x32xf32>
    %52 = math.tanh %51 : vector<2x32xf32>
    %53 = arith.mulf %48, %52 : vector<2x32xf32>
    %c4 = arith.constant 4 : index
    %c0_26 = arith.constant 0 : index
    %54 = vector.load %arg15[%c4, %c0_26] : memref<16x128xf32, #tpu.memory_space<vmem>>, vector<2x128xf32>
    %cst_27 = arith.constant dense<0.000000e+00> : vector<2x128xf32>
    %55 = tpu.matmul %53, %13, %cst_27 {dimension_numbers = #tpu.dot_dimension_numbers<[1], [0], [0], [1], [0, 0, 1, 1], [], []>} : vector<2x32xf32>, vector<32x128xf32>, vector<2x128xf32> -> vector<2x128xf32>
    %56 = arith.addf %54, %55 : vector<2x128xf32>
    %57 = arith.negf %56 : vector<2x128xf32>
    %58 = math.exp %57 : vector<2x128xf32>
    %cst_28 = arith.constant 1.000000e+00 : f32
    %59 = vector.broadcast %cst_28 : f32 to vector<2x128xf32>
    %60 = arith.addf %59, %58 : vector<2x128xf32>
    %61 = arith.divf %59, %60 : vector<2x128xf32>
    %62 = math.tanh %56 : vector<2x128xf32>
    %63 = vector.extract_strided_slice %61 {offsets = [0, 0], sizes = [2, 32], strides = [1, 1]} : vector<2x128xf32> to vector<2x32xf32>
    %64 = vector.extract_strided_slice %61 {offsets = [0, 32], sizes = [2, 32], strides = [1, 1]} : vector<2x128xf32> to vector<2x32xf32>
    %65 = vector.extract_strided_slice %62 {offsets = [0, 64], sizes = [2, 32], strides = [1, 1]} : vector<2x128xf32> to vector<2x32xf32>
    %66 = vector.extract_strided_slice %61 {offsets = [0, 96], sizes = [2, 32], strides = [1, 1]} : vector<2x128xf32> to vector<2x32xf32>
    %67 = arith.mulf %64, %51 : vector<2x32xf32>
    %68 = arith.mulf %63, %65 : vector<2x32xf32>
    %69 = arith.addf %67, %68 : vector<2x32xf32>
    %70 = math.tanh %69 : vector<2x32xf32>
    %71 = arith.mulf %66, %70 : vector<2x32xf32>
    %c6 = arith.constant 6 : index
    %c0_29 = arith.constant 0 : index
    %72 = vector.load %arg15[%c6, %c0_29] : memref<16x128xf32, #tpu.memory_space<vmem>>, vector<2x128xf32>
    %cst_30 = arith.constant dense<0.000000e+00> : vector<2x128xf32>
    %73 = tpu.matmul %71, %13, %cst_30 {dimension_numbers = #tpu.dot_dimension_numbers<[1], [0], [0], [1], [0, 0, 1, 1], [], []>} : vector<2x32xf32>, vector<32x128xf32>, vector<2x128xf32> -> vector<2x128xf32>
    %74 = arith.addf %72, %73 : vector<2x128xf32>
    %75 = arith.negf %74 : vector<2x128xf32>
    %76 = math.exp %75 : vector<2x128xf32>
    %cst_31 = arith.constant 1.000000e+00 : f32
    %77 = vector.broadcast %cst_31 : f32 to vector<2x128xf32>
    %78 = arith.addf %77, %76 : vector<2x128xf32>
    %79 = arith.divf %77, %78 : vector<2x128xf32>
    %80 = math.tanh %74 : vector<2x128xf32>
    %81 = vector.extract_strided_slice %79 {offsets = [0, 0], sizes = [2, 32], strides = [1, 1]} : vector<2x128xf32> to vector<2x32xf32>
    %82 = vector.extract_strided_slice %79 {offsets = [0, 32], sizes = [2, 32], strides = [1, 1]} : vector<2x128xf32> to vector<2x32xf32>
    %83 = vector.extract_strided_slice %80 {offsets = [0, 64], sizes = [2, 32], strides = [1, 1]} : vector<2x128xf32> to vector<2x32xf32>
    %84 = vector.extract_strided_slice %79 {offsets = [0, 96], sizes = [2, 32], strides = [1, 1]} : vector<2x128xf32> to vector<2x32xf32>
    %85 = arith.mulf %82, %69 : vector<2x32xf32>
    %86 = arith.mulf %81, %83 : vector<2x32xf32>
    %87 = arith.addf %85, %86 : vector<2x32xf32>
    %88 = math.tanh %87 : vector<2x32xf32>
    %89 = arith.mulf %84, %88 : vector<2x32xf32>
    %c8 = arith.constant 8 : index
    %c0_32 = arith.constant 0 : index
    %90 = vector.load %arg15[%c8, %c0_32] : memref<16x128xf32, #tpu.memory_space<vmem>>, vector<2x128xf32>
    %cst_33 = arith.constant dense<0.000000e+00> : vector<2x128xf32>
    %91 = tpu.matmul %89, %13, %cst_33 {dimension_numbers = #tpu.dot_dimension_numbers<[1], [0], [0], [1], [0, 0, 1, 1], [], []>} : vector<2x32xf32>, vector<32x128xf32>, vector<2x128xf32> -> vector<2x128xf32>
    %92 = arith.addf %90, %91 : vector<2x128xf32>
    %93 = arith.negf %92 : vector<2x128xf32>
    %94 = math.exp %93 : vector<2x128xf32>
    %cst_34 = arith.constant 1.000000e+00 : f32
    %95 = vector.broadcast %cst_34 : f32 to vector<2x128xf32>
    %96 = arith.addf %95, %94 : vector<2x128xf32>
    %97 = arith.divf %95, %96 : vector<2x128xf32>
    %98 = math.tanh %92 : vector<2x128xf32>
    %99 = vector.extract_strided_slice %97 {offsets = [0, 0], sizes = [2, 32], strides = [1, 1]} : vector<2x128xf32> to vector<2x32xf32>
    %100 = vector.extract_strided_slice %97 {offsets = [0, 32], sizes = [2, 32], strides = [1, 1]} : vector<2x128xf32> to vector<2x32xf32>
    %101 = vector.extract_strided_slice %98 {offsets = [0, 64], sizes = [2, 32], strides = [1, 1]} : vector<2x128xf32> to vector<2x32xf32>
    %102 = vector.extract_strided_slice %97 {offsets = [0, 96], sizes = [2, 32], strides = [1, 1]} : vector<2x128xf32> to vector<2x32xf32>
    %103 = arith.mulf %100, %87 : vector<2x32xf32>
    %104 = arith.mulf %99, %101 : vector<2x32xf32>
    %105 = arith.addf %103, %104 : vector<2x32xf32>
    %106 = math.tanh %105 : vector<2x32xf32>
    %107 = arith.mulf %102, %106 : vector<2x32xf32>
    %c10 = arith.constant 10 : index
    %c0_35 = arith.constant 0 : index
    %108 = vector.load %arg15[%c10, %c0_35] : memref<16x128xf32, #tpu.memory_space<vmem>>, vector<2x128xf32>
    %cst_36 = arith.constant dense<0.000000e+00> : vector<2x128xf32>
    %109 = tpu.matmul %107, %13, %cst_36 {dimension_numbers = #tpu.dot_dimension_numbers<[1], [0], [0], [1], [0, 0, 1, 1], [], []>} : vector<2x32xf32>, vector<32x128xf32>, vector<2x128xf32> -> vector<2x128xf32>
    %110 = arith.addf %108, %109 : vector<2x128xf32>
    %111 = arith.negf %110 : vector<2x128xf32>
    %112 = math.exp %111 : vector<2x128xf32>
    %cst_37 = arith.constant 1.000000e+00 : f32
    %113 = vector.broadcast %cst_37 : f32 to vector<2x128xf32>
    %114 = arith.addf %113, %112 : vector<2x128xf32>
    %115 = arith.divf %113, %114 : vector<2x128xf32>
    %116 = math.tanh %110 : vector<2x128xf32>
    %117 = vector.extract_strided_slice %115 {offsets = [0, 0], sizes = [2, 32], strides = [1, 1]} : vector<2x128xf32> to vector<2x32xf32>
    %118 = vector.extract_strided_slice %115 {offsets = [0, 32], sizes = [2, 32], strides = [1, 1]} : vector<2x128xf32> to vector<2x32xf32>
    %119 = vector.extract_strided_slice %116 {offsets = [0, 64], sizes = [2, 32], strides = [1, 1]} : vector<2x128xf32> to vector<2x32xf32>
    %120 = vector.extract_strided_slice %115 {offsets = [0, 96], sizes = [2, 32], strides = [1, 1]} : vector<2x128xf32> to vector<2x32xf32>
    %121 = arith.mulf %118, %105 : vector<2x32xf32>
    %122 = arith.mulf %117, %119 : vector<2x32xf32>
    %123 = arith.addf %121, %122 : vector<2x32xf32>
    %124 = math.tanh %123 : vector<2x32xf32>
    %125 = arith.mulf %120, %124 : vector<2x32xf32>
    %c12 = arith.constant 12 : index
    %c0_38 = arith.constant 0 : index
    %126 = vector.load %arg15[%c12, %c0_38] : memref<16x128xf32, #tpu.memory_space<vmem>>, vector<2x128xf32>
    %cst_39 = arith.constant dense<0.000000e+00> : vector<2x128xf32>
    %127 = tpu.matmul %125, %13, %cst_39 {dimension_numbers = #tpu.dot_dimension_numbers<[1], [0], [0], [1], [0, 0, 1, 1], [], []>} : vector<2x32xf32>, vector<32x128xf32>, vector<2x128xf32> -> vector<2x128xf32>
    %128 = arith.addf %126, %127 : vector<2x128xf32>
    %129 = arith.negf %128 : vector<2x128xf32>
    %130 = math.exp %129 : vector<2x128xf32>
    %cst_40 = arith.constant 1.000000e+00 : f32
    %131 = vector.broadcast %cst_40 : f32 to vector<2x128xf32>
    %132 = arith.addf %131, %130 : vector<2x128xf32>
    %133 = arith.divf %131, %132 : vector<2x128xf32>
    %134 = math.tanh %128 : vector<2x128xf32>
    %135 = vector.extract_strided_slice %133 {offsets = [0, 0], sizes = [2, 32], strides = [1, 1]} : vector<2x128xf32> to vector<2x32xf32>
    %136 = vector.extract_strided_slice %133 {offsets = [0, 32], sizes = [2, 32], strides = [1, 1]} : vector<2x128xf32> to vector<2x32xf32>
    %137 = vector.extract_strided_slice %134 {offsets = [0, 64], sizes = [2, 32], strides = [1, 1]} : vector<2x128xf32> to vector<2x32xf32>
    %138 = vector.extract_strided_slice %133 {offsets = [0, 96], sizes = [2, 32], strides = [1, 1]} : vector<2x128xf32> to vector<2x32xf32>
    %139 = arith.mulf %136, %123 : vector<2x32xf32>
    %140 = arith.mulf %135, %137 : vector<2x32xf32>
    %141 = arith.addf %139, %140 : vector<2x32xf32>
    %142 = math.tanh %141 : vector<2x32xf32>
    %143 = arith.mulf %138, %142 : vector<2x32xf32>
    %c14 = arith.constant 14 : index
    %c0_41 = arith.constant 0 : index
    %144 = vector.load %arg15[%c14, %c0_41] : memref<16x128xf32, #tpu.memory_space<vmem>>, vector<2x128xf32>
    %cst_42 = arith.constant dense<0.000000e+00> : vector<2x128xf32>
    %145 = tpu.matmul %143, %13, %cst_42 {dimension_numbers = #tpu.dot_dimension_numbers<[1], [0], [0], [1], [0, 0, 1, 1], [], []>} : vector<2x32xf32>, vector<32x128xf32>, vector<2x128xf32> -> vector<2x128xf32>
    %146 = arith.addf %144, %145 : vector<2x128xf32>
    %147 = arith.negf %146 : vector<2x128xf32>
    %148 = math.exp %147 : vector<2x128xf32>
    %cst_43 = arith.constant 1.000000e+00 : f32
    %149 = vector.broadcast %cst_43 : f32 to vector<2x128xf32>
    %150 = arith.addf %149, %148 : vector<2x128xf32>
    %151 = arith.divf %149, %150 : vector<2x128xf32>
    %152 = math.tanh %146 : vector<2x128xf32>
    %153 = vector.extract_strided_slice %151 {offsets = [0, 0], sizes = [2, 32], strides = [1, 1]} : vector<2x128xf32> to vector<2x32xf32>
    %154 = vector.extract_strided_slice %151 {offsets = [0, 32], sizes = [2, 32], strides = [1, 1]} : vector<2x128xf32> to vector<2x32xf32>
    %155 = vector.extract_strided_slice %152 {offsets = [0, 64], sizes = [2, 32], strides = [1, 1]} : vector<2x128xf32> to vector<2x32xf32>
    %156 = vector.extract_strided_slice %151 {offsets = [0, 96], sizes = [2, 32], strides = [1, 1]} : vector<2x128xf32> to vector<2x32xf32>
    %157 = arith.mulf %154, %141 : vector<2x32xf32>
    %158 = arith.mulf %153, %155 : vector<2x32xf32>
    %159 = arith.addf %157, %158 : vector<2x32xf32>
    %160 = math.tanh %159 : vector<2x32xf32>
    %161 = arith.mulf %156, %160 : vector<2x32xf32>
    %162 = tpu.concatenate %35, %53, %71, %89, %107, %125, %143, %161 in 0 : vector<2x32xf32>, vector<2x32xf32>, vector<2x32xf32>, vector<2x32xf32>, vector<2x32xf32>, vector<2x32xf32>, vector<2x32xf32>, vector<2x32xf32> -> vector<16x32xf32>
    %163 = arith.truncf %162 : vector<16x32xf32> to vector<16x32xbf16>
    %c0_44 = arith.constant 0 : index
    %c0_45 = arith.constant 0 : index
    %164 = vector.load %arg14[%c0_44, %c0_45] : memref<16x32xbf16, #tpu.memory_space<vmem>>, vector<16x32xbf16>
    tpu.vector_store %arg14[%c0_44, %c0_45], %163 {strides = array<i32>} : memref<16x32xbf16, #tpu.memory_space<vmem>>, vector<16x32xbf16>,
    %c0_46 = arith.constant 0 : index
    %c0_47 = arith.constant 0 : index
    %c0_48 = arith.constant 0 : index
    %165 = vector.load %arg12[%c0_46, %c0_47, %c0_48] : memref<1x2x32xf32, #tpu.memory_space<vmem>>, vector<1x2x32xf32>
    %166 = vector.shape_cast %165 : vector<1x2x32xf32> to vector<2x32xf32>
    %167 = vector.shape_cast %161 : vector<2x32xf32> to vector<1x2x32xf32>
    tpu.vector_store %arg12[%c0_46, %c0_47, %c0_48], %167 {strides = array<i32>} : memref<1x2x32xf32, #tpu.memory_space<vmem>>, vector<1x2x32xf32>,
    %c0_49 = arith.constant 0 : index
    %c0_50 = arith.constant 0 : index
    %c0_51 = arith.constant 0 : index
    %168 = vector.load %arg13[%c0_49, %c0_50, %c0_51] : memref<1x2x32xf32, #tpu.memory_space<vmem>>, vector<1x2x32xf32>
    %169 = vector.shape_cast %168 : vector<1x2x32xf32> to vector<2x32xf32>
    %170 = vector.shape_cast %159 : vector<2x32xf32> to vector<1x2x32xf32>
    tpu.vector_store %arg13[%c0_49, %c0_50, %c0_51], %170 {strides = array<i32>} : memref<1x2x32xf32, #tpu.memory_space<vmem>>, vector<1x2x32xf32>,
    %c1_i32 = arith.constant 1 : i32
    %171 = arith.cmpi eq, %arg0, %c1_i32 : i32
    %172 = arith.extui %171 : i1 to i32
    %c0_i32_52 = arith.constant 0 : i32
    %173 = arith.cmpi ne, %172, %c0_i32_52 : i32
    scf.if %173 {
      %c0_53 = arith.constant 0 : index
      %c0_54 = arith.constant 0 : index
      %174 = vector.load %arg14[%c0_53, %c0_54] : memref<16x32xbf16, #tpu.memory_space<vmem>>, vector<16x32xbf16>
      %c0_55 = arith.constant 0 : index
      %c0_56 = arith.constant 0 : index
      %175 = vector.load %arg9[%c0_55, %c0_56] : memref<32x128xbf16, #tpu.memory_space<vmem>>, vector<32x128xbf16>
      %cst_57 = arith.constant dense<0.000000e+00> : vector<16x128xf32>
      %176 = tpu.matmul %174, %175, %cst_57 {dimension_numbers = #tpu.dot_dimension_numbers<[1], [0], [0], [1], [0, 0, 1, 1], [], []>} : vector<16x32xbf16>, vector<32x128xbf16>, vector<16x128xf32> -> vector<16x128xf32>
      %c0_58 = arith.constant 0 : index
      %c0_59 = arith.constant 0 : index
      %177 = vector.load %arg10[%c0_58, %c0_59] : memref<1x128xf32, #tpu.memory_space<vmem>>, vector<1x128xf32>
      %178 = vector.broadcast %177 : vector<1x128xf32> to vector<16x128xf32>
      %179 = arith.addf %176, %178 : vector<16x128xf32>
      %c0_60 = arith.constant 0 : index
      %c0_61 = arith.constant 0 : index
      %180 = vector.load %arg11[%c0_60, %c0_61] : memref<16x128xf32, #tpu.memory_space<vmem>>, vector<16x128xf32>
      tpu.vector_store %arg11[%c0_60, %c0_61], %179 {strides = array<i32>} : memref<16x128xf32, #tpu.memory_space<vmem>>, vector<16x128xf32>,
    } else {
    }
    return
  }
  func.func @transform_0(%arg0: i32) -> (i32, i32) {
    %c0_i32 = arith.constant 0 : i32
    %c0_i32_0 = arith.constant 0 : i32
    %c0_i32_1 = arith.constant 0 : i32
    return %c0_i32, %c0_i32_0 : i32, i32
  }
  func.func @transform_1(%arg0: i32) -> (i32, i32) {
    %c0_i32 = arith.constant 0 : i32
    %c0_i32_0 = arith.constant 0 : i32
    %c0_i32_1 = arith.constant 0 : i32
    return %c0_i32, %c0_i32_0 : i32, i32
  }
  func.func @transform_2(%arg0: i32) -> (i32, i32) {
    %c0_i32 = arith.constant 0 : i32
    %c0_i32_0 = arith.constant 0 : i32
    %c0_i32_1 = arith.constant 0 : i32
    return %c0_i32, %c0_i32_0 : i32, i32
  }
  func.func @transform_3(%arg0: i32) -> (i32, i32, i32) {
    %c0_i32 = arith.constant 0 : i32
    %c0_i32_0 = arith.constant 0 : i32
    %c0_i32_1 = arith.constant 0 : i32
    return %arg0, %c0_i32, %c0_i32_0 : i32, i32, i32
  }
  func.func @transform_4(%arg0: i32) -> (i32, i32, i32) {
    %c0_i32 = arith.constant 0 : i32
    %c0_i32_0 = arith.constant 0 : i32
    %c0_i32_1 = arith.constant 0 : i32
    return %arg0, %c0_i32, %c0_i32_0 : i32, i32, i32
  }
  func.func @transform_5(%arg0: i32) -> (i32, i32, i32) {
    %c0_i32 = arith.constant 0 : i32
    %c0_i32_0 = arith.constant 0 : i32
    %c0_i32_1 = arith.constant 0 : i32
    return %arg0, %c0_i32, %c0_i32_0 : i32, i32, i32
  }
  func.func @transform_6(%arg0: i32) -> (i32, i32, i32) {
    %c0_i32 = arith.constant 0 : i32
    %c0_i32_0 = arith.constant 0 : i32
    %c0_i32_1 = arith.constant 0 : i32
    return %arg0, %c0_i32, %c0_i32_0 : i32, i32, i32
  }
  func.func @transform_7(%arg0: i32) -> (i32, i32, i32) {
    %c0_i32 = arith.constant 0 : i32
    %c0_i32_0 = arith.constant 0 : i32
    %c0_i32_1 = arith.constant 0 : i32
    return %arg0, %c0_i32, %c0_i32_0 : i32, i32, i32
  }
  func.func @transform_8(%arg0: i32) -> (i32, i32) {
    %c0_i32 = arith.constant 0 : i32
    %c0_i32_0 = arith.constant 0 : i32
    %c0_i32_1 = arith.constant 0 : i32
    return %c0_i32, %c0_i32_0 : i32, i32
  }
  func.func @transform_9(%arg0: i32) -> (i32, i32) {
    %c0_i32 = arith.constant 0 : i32
    %c0_i32_0 = arith.constant 0 : i32
    %c0_i32_1 = arith.constant 0 : i32
    return %c0_i32, %c0_i32_0 : i32, i32
  }
  func.func @transform_10(%arg0: i32) -> (i32, i32) {
    %c0_i32 = arith.constant 0 : i32
    %c0_i32_0 = arith.constant 0 : i32
    %c0_i32_1 = arith.constant 0 : i32
    return %c0_i32, %c0_i32_0 : i32, i32
  }
  func.func @transform_11(%arg0: i32) -> (i32, i32, i32) {
    %c0_i32 = arith.constant 0 : i32
    %c0_i32_0 = arith.constant 0 : i32
    %c0_i32_1 = arith.constant 0 : i32
    return %arg0, %c0_i32, %c0_i32_0 : i32, i32, i32
  }
  func.func @transform_12(%arg0: i32) -> (i32, i32, i32) {
    %c0_i32 = arith.constant 0 : i32
    %c0_i32_0 = arith.constant 0 : i32
    %c0_i32_1 = arith.constant 0 : i32
    return %arg0, %c0_i32, %c0_i32_0 : i32, i32, i32
  }
}

</mosaic_0001>

<bundles_post_ra>
// kernel: tpu_custom_call.1
= control target key start
LH: loop header
LB: loop body
LE: loop exit
PB: predicated region body
PF: predicated region fallthrough
CT: control target
= control target key end

     0   :  { %s2931_s0 = inlined_call_operand.vmem [shape: f32[16,4], index: 0, kind: input, shape index: {}]   ;;  %s2932_s1 = inlined_call_operand.vmem [shape: bf16[4,32], index: 1, kind: input, shape index: {}]   ;;  %s2933_s2 = inlined_call_operand.vmem [shape: f32[1,32], index: 2, kind: input, shape index: {}]   ;;  %s2934_s3 = inlined_call_operand.hbm [shape: bf16[2,32,128], index: 3, kind: input, shape index: {}]   ;;  %s2935_s4 = inlined_call_operand.hbm [shape: f32[2,32,128], index: 4, kind: input, shape index: {}]   ;;  %s2936_s5 = inlined_call_operand.vmem [shape: f32[2,1,128], index: 5, kind: input, shape index: {}]   ;;  %s2937_s6 = inlined_call_operand.vmem [shape: f32[2,2,32], index: 6, kind: input, shape index: {}]   ;;  %s2938_s7 = inlined_call_operand.vmem [shape: f32[2,2,32], index: 7, kind: input, shape index: {}]   ;;  %s2939_s8 = inlined_call_operand.vmem [shape: bf16[32,128], index: 8, kind: input, shape index: {}]   ;;  %s2940_s9 = inlined_call_operand.vmem [shape: f32[1,128], index: 9, kind: input, shape index: {}]   ;;  %s2941_s10 = inlined_call_operand.hbm [shape: f32[16,128], index: 10, kind: output, shape index: {0}]   ;;  %s2942_s11 = inlined_call_operand.hbm [shape: f32[2,2,32], index: 11, kind: output, shape index: {1}]   ;;  %s2943_s12 = inlined_call_operand.hbm [shape: f32[2,2,32], index: 12, kind: output, shape index: {2}]  }
   0x1   :  { %2952 = sst [smem:[#allocation21_spill]] %s2934_s3 }
   0x2   :  { %2953 = sst [smem:[#allocation22_spill]] %s2941_s10 }
   0x3   :  { %18 = vsyncpa [#allocation5], 0 }
   0x4   :  { %20 = vsyncpa [#allocation5 + $0x1], 0 }
   0x5   :  { %21 = vsyncpa [#allocation8], 0 }
   0x6   :  { %23 = vsyncpa [#allocation8 + $0x1], 0 }
   0x7   :  { %24 = vsyncpa [#allocation6], 0 }
   0x8   :  { %25 = vsyncpa [#allocation11], 0 }
   0x9   :  { %27 = vsyncpa [#allocation11 + $0x1], 0  ;;  %s2470_s21 = smov 0   ;;  %s2472_s22 = smov 0  }
   0xa   :  { %s2474_s23 = smov 0   ;;  %s2476_s24 = smov 0  }
   0xb LB: > { %2954 = sst [smem:[#allocation17_spill]] %s2379_s23  ;;  %s2489_s25 = sadd.s32 4294967295, %s2383_s24   ;;  %s2383_s24 = sphi %s2476_s24, %s2977_s24   ;;  %s2379_s23 = sphi %s2474_s23, %s2979_s23   ;;  %s2375_s22 = sphi %s2472_s22, %s2981_s22   ;;  %s2371_s21 = sphi %s2470_s21, %s2980_s21  }
   0xc   : > { %s2944_s26 = sadd.s32 4294967294, %s2383_s24   ;;  %s2493_s27 = sadd.s32 1, %s2383_s24  }
   0xd   : > { %2955 = sst [smem:[#allocation18_spill]] %s2493_s27  ;;  %s103_s28 = sadd.s32 1, %s2379_s23 }
   0xe   : > { %s100_s29 = ssub.s32 %s2383_s24, %s2493_s27  ;;  %p110_p0 = scmp.ne.s32.totalorder %s2379_s23, %s2375_s22 }
   0xf   : > { %p101_p1 = scmp.eq.s32.totalorder %s100_s29, 0  ;;  %p111_p2 = scmp.eq.s32.totalorder %s2383_s24, 0 }
  0x10   : > { %p116_p3 = scmp.ne.s32.totalorder %s2375_s22, %s2371_s21  ;;  %p117_p4 = scmp.eq.s32.totalorder %s2489_s25, 0 }
  0x11   : > { %s2504_s30 = scalar_select %p101_p1, %s2379_s23, %s103_s28  }
  0x12   : > { %p2506_p5 = por %p111_p2, %p110_p0  ;;  %p2510_p6 = por %p117_p4, %p116_p3 }
  0x13   : > { %2956 = sst [smem:[#allocation19_spill]] %s2504_s30  ;;  %p2948_p7 = scmp.eq.s32.totalorder %s2489_s25, 1 }
  0x14   : > { %s2958_s14 = scalar_select %p2510_p6, 1, 0 }
  0x15   : > { %p313_p8 = scmp.eq.s32.totalorder %s2944_s26, 1  ;;  %p2083_p10 = scmp.lt.s32.totalorder %s2383_s24, 2 }
  0x16   : > { %p2521_p11 = por %p2948_p7, %p110_p0  ;;  %s2530_s17 = sand.u32 1, %s2379_s23  }
  0x17   : > { %p2525_p12 = por %p313_p8, %p116_p3  ;;  %s1893_s18 = sshll.u32 %s2383_s24, 8 }
  0x18   : > { %s2959_s15 = scalar_select %p2521_p11, 1, 0 }
  0x19   : > { %s2960_s16 = scalar_select %p2525_p12, 1, 0 }
  0x1a   : > { %s1838_s19 = sshll.u32 %s2530_s17, 4  ;;  %s2962_s3 = sld [smem:[#allocation21_spill]] }
  0x1b   : > { %2961 = sst [smem:[#allocation20_spill]] %s2960_s16  ;;  %s378_s29 = scalar_lea.vmem [#allocation4], %s1838_s19 }
  0x1c   : > { %s385_s26 = sshll.u32 %s378_s29, 4  ;;  %p2541_p13 = pnand %p2083_p10, %p2506_p5  ;;  %s2545_s26 = int_to_ptr.vmem [resolvable:$true] %s385_s26 }
  0x1e   : > { %p2207_p1 = pneg %p2541_p13 }
  0x20   : > { %s2537_s28 = scalar_lea.hbm %s2962_s3, %s1893_s18  ;;  %s2210_s13 = scalar_lea.hbm %s2962_s3, 512 }
  0x21   : > { %s2205_s27 = scalar_lea.hbm %s2537_s28, 256  ;;  %p2211_p4 = scmp.lt.s32.totalorder %s2537_s28, %s2962_s3 }
  0x22   : > { %p2206_p0 = scmp.ne.s32.totalorder %s2537_s28, %s2205_s27  ;;  %p2212_p5 = scmp.lt.s32.totalorder %s2210_s13, %s2205_s27 }
  0x24   : > { %p2208_p2 = pnand %p2207_p1, %p2206_p0  ;;  %p2213_p8 = por %p2212_p5, %p2211_p4 }
  0x26   : > { %p2209_p3 = pneg %p2208_p2 }
  0x28   : > { %p2214_p10 = pnand %p2213_p8, %p2209_p3 }
  0x2a   : > { %2217 = shalt.err (!%p2214_p10)
}
  0x2b   : > { %s2218_s29 = scalar_lea.vmem %s2545_s26, 256  ;;  %s2385_s18 = smov [#allocation4]  }
  0x2c   : > { %p2219_p9 = scmp.ne.s32.totalorder %s2545_s26, %s2218_s29  ;;  %s2223_s19 = sshll.u32 %s2385_s18, 4  ;;  %s2224_s19 = int_to_ptr.vmem [resolvable:$false] %s2223_s19 }
  0x2d   : > { %s2225_s23 = scalar_lea.vmem %s2224_s19, 512  ;;  %p2226_p7 = scmp.lt.s32.totalorder %s2545_s26, %s2224_s19 }
  0x2e   : > { %p2221_p0 = pnand %p2219_p9, %p2207_p1  ;;  %p2227_p12 = scmp.lt.s32.totalorder %s2225_s23, %s2218_s29 }
  0x30   : > { %p2222_p2 = pneg %p2221_p0  ;;  %p2228_p11 = por %p2227_p12, %p2226_p7 }
  0x32   : > { %p2229_p4 = pnand %p2228_p11, %p2222_p2 }
  0x34   : > { %2232 = shalt.err (!%p2229_p4)
}
  0x35   : > { %s2386_s27 = smov 64   ;;  %s2387_s13 = smov 4  }
  0x36   : > { %s2964_s20 = scalar_lea.sflag [#allocation5], %s2530_s17  ;;  %p1844_p9 = scmp.ge.s32.totalorder %s2383_s24, 1 }
  0x37   : > { %2072 = dma.hbm_to_vmem [thread:$0]  (!%p2541_p13), %s2537_s28, 256, %s2545_s26, %s2964_s20, %s2386_s27, %s2386_s27, %s2387_s13  }
  0x38   : > { %p434_p3 = scmp.lt.s32.totalorder %s2383_s24, 3  ;;  %s1841_s23 = sshll.u32 %s2530_s17, 5 }
  0x39   : > { %s1894_s29 = sshll.u32 %s2383_s24, 9  ;;  %s399_s18 = scalar_lea.vmem [#allocation7], %s1841_s23 }
  0x3a   : > { %p2577_p7 = pnand %p1844_p9, %p434_p3  ;;  %s406_s19 = sshll.u32 %s399_s18, 4  ;;  %s2587_s19 = int_to_ptr.vmem [resolvable:$true] %s406_s19 }
  0x3b   : > { %s2585_s10 = scalar_lea.hbm %s2935_s4, %s1894_s29  ;;  %s396_s26 = scalar_lea.sflag [#allocation8], %s2530_s17 }
  0x3c   : > { %s2233_s28 = scalar_lea.hbm %s2585_s10, 512  ;;  %s2238_s20 = scalar_lea.hbm %s2935_s4, 1024 }
  0x3d   : > { %p2234_p11 = scmp.ne.s32.totalorder %s2585_s10, %s2233_s28  ;;  %p2239_p8 = scmp.lt.s32.totalorder %s2585_s10, %s2935_s4 }
  0x3e   : > { %p2240_p10 = scmp.lt.s32.totalorder %s2238_s20, %s2233_s28 }
  0x3f   : > { %p2236_p12 = pnand %p2234_p11, %p2207_p1 }
  0x40   : > { %p2241_p0 = por %p2240_p10, %p2239_p8 }
  0x41   : > { %p2237_p5 = pneg %p2236_p12 }
  0x43   : > { %p2242_p2 = pnand %p2241_p0, %p2237_p5 }
  0x45   : > { %2245 = shalt.err (!%p2242_p2)
}
  0x46   : > { %s2246_s16 = scalar_lea.vmem %s2587_s19, 512  ;;  %s2388_s29 = smov [#allocation7]  }
  0x47   : > { %p2247_p4 = scmp.ne.s32.totalorder %s2587_s19, %s2246_s16  ;;  %s2251_s18 = sshll.u32 %s2388_s29, 4  ;;  %s2252_s18 = int_to_ptr.vmem [resolvable:$false] %s2251_s18 }
  0x48   : > { %s2253_s27 = scalar_lea.vmem %s2252_s18, 1024  ;;  %p2254_p11 = scmp.lt.s32.totalorder %s2587_s19, %s2252_s18 }
  0x49   : > { %p2249_p9 = pnand %p2247_p4, %p2207_p1  ;;  %p2255_p12 = scmp.lt.s32.totalorder %s2253_s27, %s2246_s16 }
  0x4b   : > { %p2250_p3 = pneg %p2249_p9  ;;  %p2256_p6 = por %p2255_p12, %p2254_p11 }
  0x4d   : > { %p2257_p8 = pnand %p2256_p6, %p2250_p3 }
  0x4f   : > { %2260 = shalt.err (!%p2257_p8)
}
  0x50   : > { %s2389_s28 = smov 128   ;;  %s2390_s13 = smov 8  }
  0x51   : > { %2075 = dma.hbm_to_vmem [thread:$0]  (!%p2541_p13), %s2585_s10, 512, %s2587_s19, %s396_s26, %s2389_s28, %s2389_s28, %s2390_s13  }
  0x52   : > { %438 = sbr.rel (%p2577_p7) target bundleno = 6124 (0x17ec), region = 60  ;;  %s440_s20 = sand.u32 (!%p2577_p7), 1, %s2375_s22  }
  0x53   : > { %s1845_s23 = sshll.u32 (!%p2577_p7), %s440_s20, 4  ;;  %s441_s3 = scalar_lea.sflag (!%p2577_p7), [#allocation5], %s440_s20 }
  0x54   : > { %s2617_s16 = scalar_lea.vmem (!%p2577_p7), [#allocation4], %s1845_s23  ;;  %p2966_p6 = scmp.ne.s32.totalorder (!%p2577_p7), %s2958_s14, 0 }
  0x57   : > { %2354 = dma.done.wait (%p2966_p6), %s441_s3, 256  }
  0x58   : > { %2356 = vsyncadd (%p2966_p6), %s441_s3, 4294967040  ;;  %s1846_s29 = sshll.u32 %s440_s20, 5  ;;  %s450_s30 = scalar_lea.sflag [#allocation8], %s440_s20 }
  0x59   : > { %s2623_s17 = scalar_lea.vmem [#allocation7], %s1846_s29 }
  0x5a   : > { %2358 = dma.done.wait (%p2966_p6), %s450_s30, 512  }
  0x5b   : > { %2360 = vsyncadd (%p2966_p6), %s450_s30, 4294966784  ;;  %s1847_s10 = sshll.u32 %s440_s20, 1  ;;  %p515_p13 = scmp.lt.s32.totalorder %s2489_s25, 1 }
  0x5c   : > { %s2648_s20 = scalar_lea.vmem [#allocation10], %s1847_s10  ;;  %s2650_s30 = scalar_lea.vmem [#allocation12], %s1847_s10 }
  0x5d   : > { %s2631_s21 = scalar_select %p515_p13, %s2489_s25, 1 }
  0x5e   : > { %p1851_p1 = scmp.ne.s32.totalorder %s2489_s25, 0 }
  0x5f   : > { %s517_s18 = scalar_lea.vmem %s2936_s5, %s2631_s21  ;;  %s1849_s27 = sshll.u32 %s2631_s21, 1 }
  0x60   : > { %s2641_s23 = scalar_lea.vmem %s2937_s6, %s1849_s27  ;;  %s2646_s29 = scalar_lea.vmem %s2938_s7, %s1849_s27 }
  0x61   : > { %530 = sbr.rel (%p1851_p1) target bundleno = 309 (0x135), region = 72 }
  0x66   : > { %v534_v0 = vld [vmem:[%s2932_s1] sm:$0x3]  ;;  %vm546_vm0 = vcmask 1041408   ;;  %v2391_v2 = vmov 0.0   ;;  %vm2392_vm1 = vmmov 0   ;;  %v532_v4 = vld [vmem:[%s2931_s0 + $0x8] sm:$0xff] }
  0x67   : > { %v531_v1 = vld [vmem:[%s2931_s0] sm:$0xff]  ;;  %1947 = vmatprep.subr.bf16.mxu0 %v2391_v2  ;;  %v548_v3 = vsel %vm546_vm0, %v534_v0, 0  ;;  %1949 = vmatprep.mubr.msk.bf16.mxu0 %vm2392_vm1, %v2391_v2  ;;  %vm542_vm2 = vcmask 31744   ;;  %vm599_vm3 = vcmask 257024  }
  0x68   : > { %1948 = vmatpush3.bf16.msra.mxu0 %v548_v3  ;;  %v533_v5 = vpack.c.bf16 %v532_v4, %v531_v1  ;;  %v1852_v6 = vld [vmem:[%s2933_s2] ss:$0 sm:$0xff] }
  0x6b   : > { %1950 = vmatmul.mubr.msk.bf16.vlgmr.msra.gmra.mxu0 %vm542_vm2, %v533_v5 }
 0x12b   : > { %v584_v7 = vpop.f32.mrf.mxu0 }
 0x12c   : > { %v585_v8 = vadd.f32 %v1852_v6, %v584_v7 }
 0x12d   : > { %v1951_v9 = vpop.f32.mrf.mxu0 }
 0x12e   : > { %v1895_v10 = vpack.c.bf16 %v585_v8, %v585_v8 }
 0x12f   : > { %v587_v11 = vpop.f32.mrf.mxu0 }
 0x130   : > { %600 = vst.msk [vmem:[#allocation2] sm:$0xf] %vm599_vm3, %v1895_v10  ;;  %v588_v12 = vadd.f32 %v1852_v6, %v587_v11 }
 0x131   : > { %v1952_v13 = vpop.f32.mrf.mxu0 }
 0x132   : > { %v1896_v14 = vpack.c.bf16 %v588_v12, %v588_v12 }
 0x134   : > { %601 = vst.msk [vmem:[#allocation2 + $0x4] sm:$0xf] %vm599_vm3, %v1896_v14 }
 0x135 PF: > { %v2135_v15 = vld [vmem:[%s2617_s16 + $0x8] sm:$0xff]   ;;  %v2393_v16 = vmov 0.0   ;;  %v2136_v17 = vld [vmem:[%s2617_s16] sm:$0xff]   ;;  %vm2394_vm4 = vmmov 0   ;;  %vm632_vm5 = vcmask 261120   ;;  %s2396_s21 = smov 32  }
 0x136   : > { %1953 = vmatprep.subr.bf16.mxu0 %v2393_v16  ;;  %1961 = vmatprep.subr.mxu1 %v2393_v16  ;;  %v2673_v18 = vld [vmem:[%s2623_s17 + $0x18] sm:$0xff]  ;;  %v2676_v19 = vld [vmem:[%s2623_s17 + $0x10] sm:$0xff]  ;;  %v2683_v21 = vld [vmem:[%s2623_s17 + $0x8] sm:$0xff]  ;;  %vm1508_vm6 = vcmask 1041408   ;;  %vm1510_vm7 = vcmask 1043456   ;;  %vm1512_vm8 = vcmask 1045504  }
 0x137   : > { %1954 = vmatpush3.bf16.msra.mxu0 %v2135_v15  ;;  %1957 = vmatprep.mubr.msk.bf16.mxu0 %vm2394_vm4, %v2393_v16  ;;  %v2688_v22 = vld [vmem:[%s2623_s17] sm:$0xff]  ;;  %v683_v23 = vld [vmem:[%s2641_s23] sm:$0x3]  ;;  %s2395_s23 = smov 64   ;;  %vm1529_vm9 = vcmask 257024   ;;  %vm1535_vm10 = vcmask 254976  }
 0x138   : > { %1955 = vmatprep.subr.bf16.mxu0 %v2393_v16  ;;  %1969 = vmatprep.mubr.msk.f32.mxu1 %vm2394_vm4, %v2393_v16  ;;  %v1856_v24 = vld [vmem:[%s517_s18] ss:$0 sm:$0xff]  ;;  %s2397_s18 = smov 96   ;;  %p1879_p7 = scmp.ne.s32.totalorder %s2489_s25, 1 }
 0x139   : > { %1962 = vmatpush3.msra.mxu1 %v2673_v18  ;;  %v684_v36 = vld [vmem:[%s2646_s29] sm:$0x3] }
 0x13a   : > { %1963 = vmatprep.subr.mxu1 %v2393_v16 }
 0x13b   : > { %v2137_v20 = vld [vmem:[#allocation2] sm:$0xff]   ;;  %1956 = vmatpush3.bf16.msra.mxu0 %v2136_v17  ;;  %1964 = vmatpush3.msra.mxu1 %v2676_v19 }
 0x13c   : > { %1965 = vmatprep.subr.mxu1 %v2393_v16  ;;  %1972 = vmatprep.subr.mxu0 %v2393_v16 }
 0x13d   : > { %1966 = vmatpush3.msra.mxu1 %v2683_v21 }
 0x13e   : > { %1958 = vmatmul.mubr.msk.bf16.vlgmr.msra.gmra.mxu0 %vm632_vm5, %v2137_v20  ;;  %1967 = vmatprep.subr.mxu1 %v2393_v16 }
 0x13f   : > { %1968 = vmatpush3.msra.mxu1 %v2688_v22  ;;  %1973 = vmatpush3.msra.mxu0 %v2673_v18 }
 0x140   : > { %1970 = vmatmul.mubr.msk.f32.vlgmr.msra.gmra.mxu1 %vm632_vm5, %v683_v23  ;;  %1974 = vmatprep.subr.mxu0 %v2393_v16 }
 0x141   : > { %1975 = vmatpush3.msra.mxu0 %v2676_v19  ;;  %1980 = vmatprep.mubr.msk.f32.mxu0 %vm2394_vm4, %v2393_v16 }
 0x142   : > { %1976 = vmatprep.subr.mxu0 %v2393_v16  ;;  %1983 = vmatprep.subr.mxu1 %v2393_v16 }
 0x143   : > { %1977 = vmatpush3.msra.mxu0 %v2683_v21  ;;  %1984 = vmatpush3.msra.mxu1 %v2673_v18 }
 0x144   : > { %1978 = vmatprep.subr.mxu0 %v2393_v16  ;;  %1985 = vmatprep.subr.mxu1 %v2393_v16 }
 0x145   : > { %1979 = vmatpush3.msra.mxu0 %v2688_v22  ;;  %1986 = vmatpush3.msra.mxu1 %v2676_v19 }
 0x146   : > { %1987 = vmatprep.subr.mxu1 %v2393_v16  ;;  %1991 = vmatprep.mubr.msk.f32.mxu1 %vm2394_vm4, %v2393_v16 }
 0x147   : > { %1988 = vmatpush3.msra.mxu1 %v2683_v21  ;;  %1994 = vmatprep.subr.mxu0 %v2393_v16 }
 0x148   : > { %1989 = vmatprep.subr.mxu1 %v2393_v16 }
 0x149   : > { %1990 = vmatpush3.msra.mxu1 %v2688_v22 }
 0x14a   : > { %2005 = vmatprep.subr.mxu1 %v2393_v16 }
 0x1fe   : > { %v670_v25 = vpop.f32.mrf.mxu0 }
 0x1ff   : > { %v671_v26 = vadd.f32 %v1856_v24, %v670_v25 }
 0x200   : > { %v1959_v27 = vpop.f32.mrf.mxu0  ;;  %v755_v28 = vpop.f32.mrf.mxu1 }
 0x201   : > { %677 = vst [vmem:[#allocation3] sm:$0xff] %v671_v26 }
 0x202   : > { %v673_v29 = vpop.f32.mrf.mxu0  ;;  %v1971_v30 = vpop.f32.mrf.mxu1 }
 0x203   : > { %v674_v31 = vadd.f32 %v1856_v24, %v673_v29 }
 0x204   : > { %v1960_v32 = vpop.f32.mrf.mxu0 }
 0x205   : > { %678 = vst [vmem:[#allocation3 + $0x8] sm:$0xff] %v674_v31 }
 0x208   : > { %v685_v33 = vld [vmem:[#allocation3] sm:$0x3]  ;;  %v788_v51 = vld [vmem:[#allocation3 + $0x2] sm:$0x3]  ;;  %v889_v5 = vld [vmem:[#allocation3 + $0x4] sm:$0x3] }
 0x209   : > { %v759_v34 = vadd.f32 %v755_v28, %v685_v33  ;;  %v990_v32 = vld [vmem:[#allocation3 + $0x6] sm:$0x3] }
 0x20b   : > { %2138 = vtanh.f32 %v759_v34  ;;  %v1862_v37 = vmul.f32 -1.442695, %v759_v34 }
 0x20d   : > { %2140 = vpow2.f32 %v1862_v37 }
 0x218   : > { %v2139_v35 = vpop.eup %2138 }
 0x219   : > { %773 = vrot.lane.b32.xlu0 %v2139_v35, %s2395_s23 }
 0x21a   : > { %v2141_v38 = vpop.eup %2140 }
 0x21b   : > { %v763_v39 = vadd.f32 1.0, %v2141_v38 }
 0x21d   : > { %768 = vrot.lane.b32.xlu0 %v684_v36, %s2396_s21  ;;  %2142 = vrcp.f32 %v763_v39 }
 0x22a   : > { %v2143_v40 = vpop.eup %2142 }
 0x28b   : > { %v774_v41 = vpop.permute.xlu0 %773 }
 0x28c   : > { %v776_v42 = vmul.f32 %v2143_v40, %v774_v41 }
 0x28e   : > { %778 = vrot.lane.b32.xlu1 %v776_v42, %s2396_s21 }
 0x28f   : > { %v769_v43 = vpop.permute.xlu0 %768 }
 0x290   : > { %v771_v44 = vmul.f32 %v2143_v40, %v769_v43 }
 0x300   : > { %v779_v45 = vpop.permute.xlu1 %778 }
 0x301   : > { %v781_v46 = vadd.f32 %v779_v45, %v771_v44 }
 0x303   : > { %2144 = vtanh.f32 %v781_v46 }
 0x310   : > { %v2145_v47 = vpop.eup %2144 }
 0x311   : > { %784 = vrot.lane.b32.xlu1 %v2145_v47, %s2395_s23 }
 0x383   : > { %v785_v48 = vpop.permute.xlu1 %784 }
 0x384   : > { %v2728_v49 = vmul.f32 %v2143_v40, %v785_v48 }
 0x386   : > { %790 = vrot.lane.b32.xlu0 %v2728_v49, %s2396_s21 }
 0x3f8   : > { %v791_v50 = vpop.permute.xlu0 %790 }
 0x3f9   : > { %1981 = vmatmul.mubr.msk.f32.vlgmr.msra.gmra.mxu0 %vm632_vm5, %v791_v50 }
 0x3fa   : > { %1995 = vmatpush3.msra.mxu0 %v2673_v18  ;;  %2002 = vmatprep.mubr.msk.f32.mxu0 %vm2394_vm4, %v2393_v16 }
 0x3fb   : > { %1996 = vmatprep.subr.mxu0 %v2393_v16 }
 0x3fc   : > { %1997 = vmatpush3.msra.mxu0 %v2676_v19 }
 0x3fd   : > { %1998 = vmatprep.subr.mxu0 %v2393_v16 }
 0x3fe   : > { %1999 = vmatpush3.msra.mxu0 %v2683_v21 }
 0x3ff   : > { %2000 = vmatprep.subr.mxu0 %v2393_v16 }
 0x400   : > { %2001 = vmatpush3.msra.mxu0 %v2688_v22 }
 0x401   : > { %2016 = vmatprep.subr.mxu0 %v2393_v16 }
 0x4b9   : > { %v860_v52 = vpop.f32.mrf.mxu0 }
 0x4ba   : > { %v864_v53 = vadd.f32 %v860_v52, %v788_v51  ;;  %v1091_v52 = vld [vmem:[#allocation3 + $0x8] sm:$0x3] }
 0x4bb   : > { %v1982_v54 = vpop.f32.mrf.mxu0 }
 0x4bc   : > { %2146 = vtanh.f32 %v864_v53  ;;  %v1864_v56 = vmul.f32 -1.442695, %v864_v53 }
 0x4be   : > { %2148 = vpow2.f32 %v1864_v56 }
 0x4c9   : > { %v2147_v55 = vpop.eup %2146 }
 0x4ca   : > { %874 = vrot.lane.b32.xlu1 %v2147_v55, %s2395_s23 }
 0x4cb   : > { %v2149_v57 = vpop.eup %2148 }
 0x4cc   : > { %v868_v58 = vadd.f32 1.0, %v2149_v57 }
 0x4ce   : > { %2150 = vrcp.f32 %v868_v58 }
 0x4db   : > { %v2151_v59 = vpop.eup %2150 }
 0x4dc   : > { %v872_v62 = vmul.f32 %v2151_v59, %v781_v46 }
 0x53c   : > { %v875_v60 = vpop.permute.xlu1 %874 }
 0x53d   : > { %v877_v61 = vmul.f32 %v2151_v59, %v875_v60 }
 0x53f   : > { %879 = vrot.lane.b32.xlu0 %v877_v61, %s2396_s21 }
 0x5b1   : > { %v880_v63 = vpop.permute.xlu0 %879 }
 0x5b2   : > { %v882_v0 = vadd.f32 %v880_v63, %v872_v62 }
 0x5b4   : > { %2152 = vtanh.f32 %v882_v0 }
 0x5c1   : > { %v2153_v1 = vpop.eup %2152 }
 0x5c2   : > { %885 = vrot.lane.b32.xlu1 %v2153_v1, %s2395_s23 }
 0x634   : > { %v886_v2 = vpop.permute.xlu1 %885 }
 0x635   : > { %v888_v3 = vmul.f32 %v2151_v59, %v886_v2 }
 0x637   : > { %891 = vrot.lane.b32.xlu0 %v888_v3, %s2396_s21  ;;  %v1495_v25 = vrot.slane %v888_v3, 6 }
 0x639   : > { %v1509_v29 = vsel %vm1508_vm6, %v2728_v49, %v1495_v25 }
 0x6a9   : > { %v892_v4 = vpop.permute.xlu0 %891 }
 0x6aa   : > { %1992 = vmatmul.mubr.msk.f32.vlgmr.msra.gmra.mxu1 %vm632_vm5, %v892_v4 }
 0x6ab   : > { %2006 = vmatpush3.msra.mxu1 %v2673_v18  ;;  %2013 = vmatprep.mubr.msk.f32.mxu1 %vm2394_vm4, %v2393_v16 }
 0x6ac   : > { %2007 = vmatprep.subr.mxu1 %v2393_v16 }
 0x6ad   : > { %2008 = vmatpush3.msra.mxu1 %v2676_v19 }
 0x6ae   : > { %2009 = vmatprep.subr.mxu1 %v2393_v16 }
 0x6af   : > { %2010 = vmatpush3.msra.mxu1 %v2683_v21 }
 0x6b0   : > { %2011 = vmatprep.subr.mxu1 %v2393_v16 }
 0x6b1   : > { %2012 = vmatpush3.msra.mxu1 %v2688_v22 }
 0x6b2   : > { %2027 = vmatprep.subr.mxu1 %v2393_v16 }
 0x76a   : > { %v961_v6 = vpop.f32.mrf.mxu1 }
 0x76b   : > { %v965_v7 = vadd.f32 %v961_v6, %v889_v5  ;;  %v1192_v6 = vld [vmem:[#allocation3 + $0xa] sm:$0x3] }
 0x76c   : > { %v1993_v8 = vpop.f32.mrf.mxu1 }
 0x76d   : > { %2154 = vtanh.f32 %v965_v7  ;;  %v1866_v10 = vmul.f32 -1.442695, %v965_v7 }
 0x76f   : > { %2156 = vpow2.f32 %v1866_v10 }
 0x77a   : > { %v2155_v9 = vpop.eup %2154 }
 0x77b   : > { %975 = vrot.lane.b32.xlu1 %v2155_v9, %s2395_s23 }
 0x77c   : > { %v2157_v11 = vpop.eup %2156 }
 0x77d   : > { %v969_v12 = vadd.f32 1.0, %v2157_v11 }
 0x77f   : > { %2158 = vrcp.f32 %v969_v12 }
 0x78c   : > { %v2159_v13 = vpop.eup %2158 }
 0x78d   : > { %v973_v17 = vmul.f32 %v2159_v13, %v882_v0 }
 0x7ed   : > { %v976_v14 = vpop.permute.xlu1 %975 }
 0x7ee   : > { %v978_v15 = vmul.f32 %v2159_v13, %v976_v14 }
 0x7f0   : > { %980 = vrot.lane.b32.xlu0 %v978_v15, %s2396_s21 }
 0x862   : > { %v981_v20 = vpop.permute.xlu0 %980 }
 0x863   : > { %v983_v23 = vadd.f32 %v981_v20, %v973_v17 }
 0x865   : > { %2160 = vtanh.f32 %v983_v23 }
 0x872   : > { %v2161_v24 = vpop.eup %2160 }
 0x873   : > { %986 = vrot.lane.b32.xlu1 %v2161_v24, %s2395_s23  ;;  %v1293_v24 = vld [vmem:[#allocation3 + $0xc] sm:$0x3] }
 0x8e5   : > { %v987_v26 = vpop.permute.xlu1 %986 }
 0x8e6   : > { %v989_v27 = vmul.f32 %v2159_v13, %v987_v26 }
 0x8e8   : > { %v1497_v28 = vrot.slane %v989_v27, 4  ;;  %992 = vrot.lane.b32.xlu0 %v989_v27, %s2396_s21 }
 0x8ea   : > { %v1511_v30 = vsel %vm1510_vm7, %v1509_v29, %v1497_v28 }
 0x95a   : > { %v993_v31 = vpop.permute.xlu0 %992 }
 0x95b   : > { %2003 = vmatmul.mubr.msk.f32.vlgmr.msra.gmra.mxu0 %vm632_vm5, %v993_v31 }
 0x95c   : > { %2017 = vmatpush3.msra.mxu0 %v2673_v18  ;;  %2024 = vmatprep.mubr.msk.f32.mxu0 %vm2394_vm4, %v2393_v16 }
 0x95d   : > { %2018 = vmatprep.subr.mxu0 %v2393_v16 }
 0x95e   : > { %2019 = vmatpush3.msra.mxu0 %v2676_v19 }
 0x95f   : > { %2020 = vmatprep.subr.mxu0 %v2393_v16 }
 0x960   : > { %2021 = vmatpush3.msra.mxu0 %v2683_v21 }
 0x961   : > { %2022 = vmatprep.subr.mxu0 %v2393_v16 }
 0x962   : > { %2023 = vmatpush3.msra.mxu0 %v2688_v22 }
 0x963   : > { %2038 = vmatprep.subr.mxu0 %v2393_v16 }
 0xa1b   : > { %v1062_v33 = vpop.f32.mrf.mxu0 }
 0xa1c   : > { %v1066_v34 = vadd.f32 %v1062_v33, %v990_v32 }
 0xa1d   : > { %v2004_v35 = vpop.f32.mrf.mxu0 }
 0xa1e   : > { %2162 = vtanh.f32 %v1066_v34  ;;  %v1868_v37 = vmul.f32 -1.442695, %v1066_v34 }
 0xa20   : > { %2164 = vpow2.f32 %v1868_v37 }
 0xa2b   : > { %v2163_v36 = vpop.eup %2162 }
 0xa2c   : > { %1076 = vrot.lane.b32.xlu1 %v2163_v36, %s2395_s23 }
 0xa2d   : > { %v2165_v38 = vpop.eup %2164 }
 0xa2e   : > { %v1070_v39 = vadd.f32 1.0, %v2165_v38 }
 0xa30   : > { %2166 = vrcp.f32 %v1070_v39 }
 0xa3d   : > { %v2167_v40 = vpop.eup %2166 }
 0xa3e   : > { %v1074_v43 = vmul.f32 %v2167_v40, %v983_v23 }
 0xa9e   : > { %v1077_v41 = vpop.permute.xlu1 %1076 }
 0xa9f   : > { %v1079_v42 = vmul.f32 %v2167_v40, %v1077_v41 }
 0xaa1   : > { %1081 = vrot.lane.b32.xlu0 %v1079_v42, %s2396_s21 }
 0xb13   : > { %v1082_v44 = vpop.permute.xlu0 %1081 }
 0xb14   : > { %v1084_v45 = vadd.f32 %v1082_v44, %v1074_v43 }
 0xb16   : > { %2168 = vtanh.f32 %v1084_v45 }
 0xb23   : > { %v2169_v46 = vpop.eup %2168 }
 0xb24   : > { %1087 = vrot.lane.b32.xlu1 %v2169_v46, %s2395_s23  ;;  %v1394_v46 = vld [vmem:[#allocation3 + $0xe] sm:$0x3] }
 0xb96   : > { %v1088_v47 = vpop.permute.xlu1 %1087 }
 0xb97   : > { %v1090_v48 = vmul.f32 %v2167_v40, %v1088_v47 }
 0xb99   : > { %v1499_v49 = vrot.slane %v1090_v48, 2  ;;  %1093 = vrot.lane.b32.xlu0 %v1090_v48, %s2396_s21 }
 0xb9b   : > { %v2781_v50 = vsel %vm1512_vm8, %v1511_v30, %v1499_v49 }
 0xc0b   : > { %v1094_v51 = vpop.permute.xlu0 %1093 }
 0xc0c   : > { %2014 = vmatmul.mubr.msk.f32.vlgmr.msra.gmra.mxu1 %vm632_vm5, %v1094_v51 }
 0xc0d   : > { %2028 = vmatpush3.msra.mxu1 %v2673_v18  ;;  %2035 = vmatprep.mubr.msk.f32.mxu1 %vm2394_vm4, %v2393_v16 }
 0xc0e   : > { %2029 = vmatprep.subr.mxu1 %v2393_v16 }
 0xc0f   : > { %2030 = vmatpush3.msra.mxu1 %v2676_v19 }
 0xc10   : > { %2031 = vmatprep.subr.mxu1 %v2393_v16 }
 0xc11   : > { %2032 = vmatpush3.msra.mxu1 %v2683_v21 }
 0xc12   : > { %2033 = vmatprep.subr.mxu1 %v2393_v16 }
 0xc13   : > { %2034 = vmatpush3.msra.mxu1 %v2688_v22 }
 0xccc   : > { %v1163_v53 = vpop.f32.mrf.mxu1 }
 0xccd   : > { %v1167_v54 = vadd.f32 %v1163_v53, %v1091_v52 }
 0xcce   : > { %v2015_v55 = vpop.f32.mrf.mxu1 }
 0xccf   : > { %2170 = vtanh.f32 %v1167_v54  ;;  %v1870_v57 = vmul.f32 -1.442695, %v1167_v54 }
 0xcd1   : > { %2172 = vpow2.f32 %v1870_v57 }
 0xcdc   : > { %v2171_v56 = vpop.eup %2170 }
 0xcdd   : > { %1177 = vrot.lane.b32.xlu1 %v2171_v56, %s2395_s23 }
 0xcde   : > { %v2173_v58 = vpop.eup %2172 }
 0xcdf   : > { %v1171_v59 = vadd.f32 1.0, %v2173_v58  ;;  %v1897_v58 = vpack.c.bf16 %v2781_v50, %v2781_v50 }
 0xce1   : > { %2174 = vrcp.f32 %v1171_v59 }
 0xcee   : > { %v2175_v60 = vpop.eup %2174 }
 0xcef   : > { %v1175_v63 = vmul.f32 %v2175_v60, %v1084_v45 }
 0xd4f   : > { %v1178_v61 = vpop.permute.xlu1 %1177 }
 0xd50   : > { %v1180_v62 = vmul.f32 %v2175_v60, %v1178_v61 }
 0xd52   : > { %1182 = vrot.lane.b32.xlu0 %v1180_v62, %s2396_s21 }
 0xdc4   : > { %v1183_v0 = vpop.permute.xlu0 %1182 }
 0xdc5   : > { %v1185_v1 = vadd.f32 %v1183_v0, %v1175_v63 }
 0xdc7   : > { %2176 = vtanh.f32 %v1185_v1 }
 0xdd4   : > { %v2177_v2 = vpop.eup %2176 }
 0xdd5   : > { %1188 = vrot.lane.b32.xlu1 %v2177_v2, %s2395_s23 }
 0xe47   : > { %v1189_v3 = vpop.permute.xlu1 %1188 }
 0xe48   : > { %v2796_v4 = vmul.f32 %v2175_v60, %v1189_v3 }
 0xe4a   : > { %1194 = vrot.lane.b32.xlu0 %v2796_v4, %s2396_s21 }
 0xebc   : > { %v1195_v5 = vpop.permute.xlu0 %1194 }
 0xebd   : > { %2025 = vmatmul.mubr.msk.f32.vlgmr.msra.gmra.mxu0 %vm632_vm5, %v1195_v5 }
 0xebe   : > { %2039 = vmatpush3.msra.mxu0 %v2673_v18  ;;  %2046 = vmatprep.mubr.msk.f32.mxu0 %vm2394_vm4, %v2393_v16 }
 0xebf   : > { %2040 = vmatprep.subr.mxu0 %v2393_v16 }
 0xec0   : > { %2041 = vmatpush3.msra.mxu0 %v2676_v19 }
 0xec1   : > { %2042 = vmatprep.subr.mxu0 %v2393_v16 }
 0xec2   : > { %2043 = vmatpush3.msra.mxu0 %v2683_v21 }
 0xec3   : > { %2044 = vmatprep.subr.mxu0 %v2393_v16 }
 0xec4   : > { %2045 = vmatpush3.msra.mxu0 %v2688_v22 }
 0xf7d   : > { %v1264_v7 = vpop.f32.mrf.mxu0 }
 0xf7e   : > { %v1268_v8 = vadd.f32 %v1264_v7, %v1192_v6 }
 0xf7f   : > { %v2026_v9 = vpop.f32.mrf.mxu0 }
 0xf80   : > { %2178 = vtanh.f32 %v1268_v8  ;;  %v1872_v10 = vmul.f32 -1.442695, %v1268_v8 }
 0xf82   : > { %2180 = vpow2.f32 %v1872_v10 }
 0xf8d   : > { %v2179_v18 = vpop.eup %2178 }
 0xf8e   : > { %1278 = vrot.lane.b32.xlu1 %v2179_v18, %s2395_s23 }
 0xf8f   : > { %v2181_v11 = vpop.eup %2180 }
 0xf90   : > { %v1272_v19 = vadd.f32 1.0, %v2181_v11 }
 0xf92   : > { %2182 = vrcp.f32 %v1272_v19 }
 0xf9f   : > { %v2183_v12 = vpop.eup %2182 }
 0xfa0   : > { %v1276_v16 = vmul.f32 %v2183_v12, %v1185_v1 }
0x1000   : > { %v1279_v13 = vpop.permute.xlu1 %1278 }
0x1001   : > { %v1281_v21 = vmul.f32 %v2183_v12, %v1279_v13 }
0x1003   : > { %1283 = vrot.lane.b32.xlu0 %v1281_v21, %s2396_s21 }
0x1075   : > { %v1284_v22 = vpop.permute.xlu0 %1283 }
0x1076   : > { %v1286_v14 = vadd.f32 %v1284_v22, %v1276_v16 }
0x1078   : > { %2184 = vtanh.f32 %v1286_v14 }
0x1085   : > { %v2185_v15 = vpop.eup %2184 }
0x1086   : > { %1289 = vrot.lane.b32.xlu1 %v2185_v15, %s2395_s23 }
0x10f8   : > { %v1290_v17 = vpop.permute.xlu1 %1289 }
0x10f9   : > { %v1292_v20 = vmul.f32 %v2183_v12, %v1290_v17 }
0x10fb   : > { %1295 = vrot.lane.b32.xlu0 %v1292_v20, %s2396_s21  ;;  %v1501_v39 = vrot.slane %v1292_v20, 6 }
0x10fd   : > { %v1514_v43 = vsel %vm1508_vm6, %v2796_v4, %v1501_v39 }
0x116d   : > { %v1296_v23 = vpop.permute.xlu0 %1295 }
0x116e   : > { %2036 = vmatmul.mubr.msk.f32.vlgmr.msra.gmra.mxu1 %vm632_vm5, %v1296_v23 }
0x122e   : > { %v1365_v25 = vpop.f32.mrf.mxu1 }
0x122f   : > { %v1369_v26 = vadd.f32 %v1365_v25, %v1293_v24 }
0x1230   : > { %v2037_v27 = vpop.f32.mrf.mxu1 }
0x1231   : > { %2186 = vtanh.f32 %v1369_v26  ;;  %v1874_v29 = vmul.f32 -1.442695, %v1369_v26 }
0x1233   : > { %2188 = vpow2.f32 %v1874_v29 }
0x123e   : > { %v2187_v28 = vpop.eup %2186 }
0x123f   : > { %1379 = vrot.lane.b32.xlu1 %v2187_v28, %s2395_s23 }
0x1240   : > { %v2189_v30 = vpop.eup %2188 }
0x1241   : > { %v1373_v31 = vadd.f32 1.0, %v2189_v30 }
0x1243   : > { %2190 = vrcp.f32 %v1373_v31 }
0x1250   : > { %v2191_v32 = vpop.eup %2190 }
0x1251   : > { %v1377_v35 = vmul.f32 %v2191_v32, %v1286_v14 }
0x12b1   : > { %v1380_v33 = vpop.permute.xlu1 %1379 }
0x12b2   : > { %v1382_v34 = vmul.f32 %v2191_v32, %v1380_v33 }
0x12b4   : > { %1384 = vrot.lane.b32.xlu0 %v1382_v34, %s2396_s21 }
0x1326   : > { %v1385_v36 = vpop.permute.xlu0 %1384 }
0x1327   : > { %v1387_v37 = vadd.f32 %v1385_v36, %v1377_v35 }
0x1329   : > { %2192 = vtanh.f32 %v1387_v37 }
0x1336   : > { %v2193_v38 = vpop.eup %2192 }
0x1337   : > { %1390 = vrot.lane.b32.xlu1 %v2193_v38, %s2395_s23 }
0x13a9   : > { %v1391_v40 = vpop.permute.xlu1 %1390 }
0x13aa   : > { %v1393_v41 = vmul.f32 %v2191_v32, %v1391_v40 }
0x13ac   : > { %v1503_v42 = vrot.slane %v1393_v41, 4  ;;  %1396 = vrot.lane.b32.xlu0 %v1393_v41, %s2396_s21 }
0x13ae   : > { %v1515_v44 = vsel %vm1510_vm7, %v1514_v43, %v1503_v42 }
0x141e   : > { %v1397_v45 = vpop.permute.xlu0 %1396 }
0x141f   : > { %2047 = vmatmul.mubr.msk.f32.vlgmr.msra.gmra.mxu0 %vm632_vm5, %v1397_v45 }
0x14df   : > { %v1466_v47 = vpop.f32.mrf.mxu0 }
0x14e0   : > { %v1470_v48 = vadd.f32 %v1466_v47, %v1394_v46 }
0x14e1   : > { %v2048_v49 = vpop.f32.mrf.mxu0 }
0x14e2   : > { %2194 = vtanh.f32 %v1470_v48  ;;  %v1876_v52 = vmul.f32 -1.442695, %v1470_v48 }
0x14e4   : > { %2196 = vpow2.f32 %v1876_v52 }
0x14ef   : > { %v2195_v51 = vpop.eup %2194 }
0x14f0   : > { %1480 = vrot.lane.b32.xlu1 %v2195_v51, %s2395_s23 }
0x14f1   : > { %v2197_v53 = vpop.eup %2196 }
0x14f2   : > { %v1474_v54 = vadd.f32 1.0, %v2197_v53 }
0x14f4   : > { %2198 = vrcp.f32 %v1474_v54 }
0x1501   : > { %v2199_v55 = vpop.eup %2198 }
0x1502   : > { %v1478_v59 = vmul.f32 %v2199_v55, %v1387_v37 }
0x1562   : > { %v1481_v56 = vpop.permute.xlu1 %1480 }
0x1563   : > { %v1483_v57 = vmul.f32 %v2199_v55, %v1481_v56 }
0x1565   : > { %1485 = vrot.lane.b32.xlu0 %v1483_v57, %s2396_s21 }
0x1569   : > { %1523 = vrot.lane.b32.xlu0 %v1897_v58, %s2396_s21 }
0x15d7   : > { %v1486_v60 = vpop.permute.xlu0 %1485 }
0x15d8   : > { %v1488_v61 = vadd.f32 %v1486_v60, %v1478_v59 }
0x15da   : > { %2200 = vtanh.f32 %v1488_v61 }
0x15db   : > { %v1524_v62 = vpop.permute.xlu0 %1523 }
0x15dc   : > { %1530 = vst.msk [vmem:[#allocation2] sm:$0xf] %vm1529_vm9, %v1524_v62 }
0x15e7   : > { %v2201_v63 = vpop.eup %2200 }
0x15e8   : > { %1491 = vrot.lane.b32.xlu1 %v2201_v63, %s2395_s23 }
0x165a   : > { %v1492_v0 = vpop.permute.xlu1 %1491 }
0x165b   : > { %v1494_v1 = vmul.f32 %v2199_v55, %v1492_v0 }
0x165d   : > { %v1506_v2 = vrot.slane %v1494_v1, 2  ;;  %1532 = vrot.lane.b32.xlu0 %v1494_v1, %s2396_s21 }
0x165f   : > { %v1516_v50 = vsel %vm1512_vm8, %v1515_v44, %v1506_v2 }
0x1660   : > { %v1898_v3 = vpack.c.bf16 %v1516_v50, %v1516_v50 }
0x1662   : > { %1525 = vrot.lane.b32.xlu1 %v1898_v3, %s2396_s21 }
0x1666   : > { %1538 = vrot.lane.b32.xlu1 %v1488_v61, %s2397_s18 }
0x16cf   : > { %v1533_v4 = vpop.permute.xlu0 %1532 }
0x16d0   : > { %1536 = vst.msk [vmem:[%s2648_s20] sm:$0x3] %vm1535_vm10, %v1533_v4 }
0x16d4   : > { %v1526_v5 = vpop.permute.xlu1 %1525 }
0x16d5   : > { %1531 = vst.msk [vmem:[#allocation2 + $0x4] sm:$0xf] %vm1529_vm9, %v1526_v5  ;;  %1545 = sbr.rel (%p1879_p7) target bundleno = 6059 (0x17ab), region = 76 }
0x16d8   : > { %v1539_v6 = vpop.permute.xlu1 %1538 }
0x16d9   : > { %1541 = vst.msk [vmem:[%s2650_s30] sm:$0x3] %vm1535_vm10, %v1539_v6 }
0x16da   : > { %v2202_v7 = vld [vmem:[%s2939_s8 + $0x8] sm:$0xff]   ;;  %v2398_v8 = vmov 0.0   ;;  %v2203_v9 = vld [vmem:[%s2939_s8] sm:$0xff]   ;;  %vm2399_vm11 = vmmov 0  }
0x16db   : > { %2049 = vmatprep.subr.bf16.mxu0 %v2398_v8  ;;  %2053 = vmatprep.mubr.msk.bf16.mxu0 %vm2399_vm11, %v2398_v8  ;;  %v1880_v10 = vld [vmem:[%s2940_s9] ss:$0 sm:$0xff] }
0x16dc   : > { %2050 = vmatpush3.bf16.msra.mxu0 %v2202_v7  ;;  %v2204_v18 = vld [vmem:[#allocation2] sm:$0xff]  }
0x16dd   : > { %2051 = vmatprep.subr.bf16.mxu0 %v2398_v8 }
0x16e0   : > { %2052 = vmatpush3.bf16.msra.mxu0 %v2203_v9 }
0x16e3   : > { %2054 = vmatmul.mubr.msk.bf16.vlgmr.msra.gmra.mxu0 %vm632_vm5, %v2204_v18 }
0x17a3   : > { %v1613_v11 = vpop.f32.mrf.mxu0 }
0x17a4   : > { %v1614_v19 = vadd.f32 %v1880_v10, %v1613_v11 }
0x17a5   : > { %v2055_v12 = vpop.f32.mrf.mxu0 }
0x17a6   : > { %1620 = vst [vmem:[#allocation9] sm:$0xff] %v1614_v19 }
0x17a7   : > { %v1616_v13 = vpop.f32.mrf.mxu0 }
0x17a8   : > { %v1617_v21 = vadd.f32 %v1880_v10, %v1616_v13 }
0x17a9   : > { %v2056_v16 = vpop.f32.mrf.mxu0 }
0x17aa   : > { %1621 = vst [vmem:[#allocation9 + $0x8] sm:$0xff] %v1617_v21 }
0x17ab PF: > { %s1622_s10 = sand.u32 1, %s2489_s25   ;;  %s1888_s14 = sshll.u32 %s2489_s25, 5 }
0x17ac   : > { %s2854_s17 = scalar_lea.hbm %s2942_s11, %s1888_s14  ;;  %s1654_s23 = sshll.u32 %s2648_s20, 4  ;;  %s1655_s23 = int_to_ptr.vmem [resolvable:$true] %s1654_s23 }
0x17ad   : > { %s2400_s21 = smov [#allocation9]   ;;  %s2857_s29 = scalar_lea.sflag [#allocation11], %s1622_s10 }
0x17ae   : > { %s1638_s18 = sshll.u32 %s2400_s21, 4  ;;  %s2261_s19 = scalar_lea.vmem %s1655_s23, 32  ;;  %s1639_s18 = int_to_ptr.vmem [resolvable:$true] %s1638_s18 }
0x17af   : > { %p2262_p5 = scmp.ne.s32.totalorder %s1655_s23, %s2261_s19  ;;  %p2967_p10 = scmp.ne.s32.totalorder %s2959_s15, 0 }
0x17b0   : > { %s2401_s26 = smov [#allocation10]  }
0x17b1   : > { %p2263_p0 = pnand %p2262_p5, %p2967_p10  ;;  %s2265_s28 = sshll.u32 %s2401_s26, 4  ;;  %s2266_s28 = int_to_ptr.vmem [resolvable:$false] %s2265_s28 }
0x17b2   : > { %s2267_s13 = scalar_lea.vmem %s2266_s28, 64  ;;  %p2268_p4 = scmp.lt.s32.totalorder %s1655_s23, %s2266_s28 }
0x17b3   : > { %p2264_p2 = pneg %p2263_p0  ;;  %p2269_p9 = scmp.lt.s32.totalorder %s2267_s13, %s2261_s19 }
0x17b5   : > { %p2270_p3 = por %p2269_p9, %p2268_p4 }
0x17b7   : > { %p2271_p11 = pnand %p2270_p3, %p2264_p2 }
0x17b9   : > { %2274 = shalt.err (!%p2271_p11)
}
0x17ba   : > { %s2275_s20 = scalar_lea.hbm %s2854_s17, 32  ;;  %s2279_s3 = scalar_lea.hbm %s2942_s11, 64 }
0x17bb   : > { %p2276_p12 = scmp.ne.s32.totalorder %s2854_s17, %s2275_s20  ;;  %p2280_p13 = scmp.lt.s32.totalorder %s2854_s17, %s2942_s11 }
0x17bc   : > { %p2281_p1 = scmp.lt.s32.totalorder %s2279_s3, %s2275_s20 }
0x17bd   : > { %p2277_p8 = pnand %p2276_p12, %p2967_p10 }
0x17be   : > { %p2282_p7 = por %p2281_p1, %p2280_p13 }
0x17bf   : > { %p2278_p6 = pneg %p2277_p8 }
0x17c1   : > { %p2283_p5 = pnand %p2282_p7, %p2278_p6 }
0x17c3   : > { %2286 = shalt.err (!%p2283_p5)
}
0x17c4   : > { %2063 = dma.vmem_to_hbm [thread:$0]  (%p2967_p10), %s1655_s23, 32, %s2854_s17, %s2857_s29  }
0x17c5   : > { %s2881_s28 = scalar_lea.hbm %s2943_s12, %s1888_s14  ;;  %s2287_s13 = scalar_lea.vmem %s1639_s18, 256 }
0x17c6   : > { %p2288_p0 = scmp.ne.s32.totalorder %s1639_s18, %s2287_s13  ;;  %p2968_p2 = scmp.eq.s32.totalorder %s2489_s25, 1 }
0x17c7   : > { %p2294_p3 = scmp.lt.s32.totalorder %s1639_s18, %s1639_s18  ;;  %p2295_p11 = scmp.lt.s32.totalorder %s2287_s13, %s2287_s13 }
0x17c8   : > { %p2289_p4 = pnand %p2288_p0, %p2968_p2 }
0x17c9   : > { %p2296_p12 = por %p2295_p11, %p2294_p3 }
0x17ca   : > { %p2290_p9 = pneg %p2289_p4 }
0x17cc   : > { %p2297_p8 = pnand %p2296_p12, %p2290_p9 }
0x17ce   : > { %2300 = shalt.err (!%p2297_p8)
}
0x17cf   : > { %s2402_s20 = smov 128   ;;  %s2403_s17 = smov 8  }
0x17d0   : > { %p2969_p6 = pmov %p2968_p2  ;;  %s2970_s14 = sld [smem:[#allocation22_spill]] }
0x17d1   : > { %s1667_s10 = sshll.u32 %s2650_s30, 4  ;;  %s2404_s16 = smov [#allocation12]   ;;  %s1668_s10 = int_to_ptr.vmem [resolvable:$true] %s1667_s10 }
0x17d2   : > { %s2311_s3 = scalar_lea.vmem %s1668_s10, 32  ;;  %s2315_s21 = sshll.u32 %s2404_s16, 4  ;;  %s2316_s21 = int_to_ptr.vmem [resolvable:$false] %s2315_s21 }
0x17d3   : > { %p2312_p13 = scmp.ne.s32.totalorder %s1668_s10, %s2311_s3  ;;  %s2317_s19 = scalar_lea.vmem %s2316_s21, 64 }
0x17d4   : > { %p2318_p5 = scmp.lt.s32.totalorder %s1668_s10, %s2316_s21  ;;  %p2319_p0 = scmp.lt.s32.totalorder %s2317_s19, %s2311_s3 }
0x17d5   : > { %p2313_p1 = pnand %p2312_p13, %p2967_p10 }
0x17d6   : > { %2062 = dma.vmem_to_hbm [thread:$0]  (%p2969_p6), %s1639_s18, 256, %s2970_s14, [#allocation6], %s2402_s20, %s2402_s20, %s2403_s17  }
0x17d7   : > { %p2314_p7 = pneg %p2313_p1  ;;  %p2320_p2 = por %p2319_p0, %p2318_p5 }
0x17d9   : > { %p2321_p4 = pnand %p2320_p2, %p2314_p7 }
0x17db   : > { %2324 = shalt.err (!%p2321_p4)
}
0x17dc   : > { %s2325_s30 = scalar_lea.hbm %s2881_s28, 32  ;;  %s2329_s13 = scalar_lea.hbm %s2943_s12, 64 }
0x17dd   : > { %p2326_p9 = scmp.ne.s32.totalorder %s2881_s28, %s2325_s30  ;;  %p2330_p12 = scmp.lt.s32.totalorder %s2881_s28, %s2943_s12 }
0x17de   : > { %p2331_p8 = scmp.lt.s32.totalorder %s2329_s13, %s2325_s30 }
0x17df   : > { %p2327_p3 = pnand %p2326_p9, %p2967_p10 }
0x17e0   : > { %p2332_p6 = por %p2331_p8, %p2330_p12 }
0x17e1   : > { %p2328_p11 = pneg %p2327_p3 }
0x17e3   : > { %p2333_p13 = pnand %p2332_p6, %p2328_p11 }
0x17e5   : > { %2336 = shalt.err (!%p2333_p13)
}
0x17e6   : > { %2064 = dma.vmem_to_hbm [thread:$0]  (%p2967_p10), %s1668_s10, 32, %s2881_s28, %s2857_s29  }
0x17e7   : > { %p2971_p1 = scmp.eq.s32.totalorder %s2489_s25, 1 }
0x17e9   : > { %2362 = dma.done.wait (%p2971_p1), [#allocation6], 256   ;;  %p2972_p7 = pmov %p2971_p1 }
0x17eb   : > { %2364 = vsyncadd (%p2972_p7), [#allocation6], 4294967040 }
0x17ec PF: > { %s2973_s23 = sadd.s32 4294967294, %s2383_s24   ;;  %s2974_s27 = sld [smem:[#allocation20_spill]] }
0x17ed   : > { %s1683_s14 = sand.u32 1, %s2973_s23   ;;  %p2976_p0 = scmp.ge.s32.totalorder %s2383_s24, 2 }
0x17ee   : > { %s1684_s15 = scalar_lea.sflag [#allocation11], %s1683_s14 }
0x17f2   : > { %p2975_p5 = scmp.ne.s32.totalorder %s2974_s27, 0 }
0x17f4   : > { %p2077_p2 = pnand %p2976_p0, %p2975_p5 }
0x17f6   : > { %p2078_p4 = pneg %p2077_p2 }
0x17f8   : > { %2366 = dma.done.wait (%p2078_p4), %s1684_s15, 64  }
0x17f9   : > { %2368 = vsyncadd (%p2078_p4), %s1684_s15, 4294967232  ;;  %s2977_s24 = sld [smem:[#allocation18_spill]]  ;;  %s2980_s21 = smov %s2375_s22 }
0x17fa   : > { %s2978_s29 = sld [smem:[#allocation17_spill]] }
0x17fb   : > { %s2979_s23 = sld [smem:[#allocation19_spill]] }
0x17ff   : > { %p30_p10 = scmp.ge.s32.totalorder %s2977_s24, 4  }
0x1800   : > { %s2981_s22 = smov %s2978_s29 }
0x1801   :  { %32 = sbr.rel (!%p30_p10) target bundleno = 11 (0xb), region = 159 }
0x1806   :  { %1698 = vsyncpa [#allocation5], 1 }
0x1807   :  { %1700 = vsyncpa [#allocation5 + $0x1], 1 }
0x1808   :  { %1701 = vsyncpa [#allocation8], 1 }
0x1809   :  { %1703 = vsyncpa [#allocation8 + $0x1], 1 }
0x180a   :  { %1704 = vsyncpa [#allocation6], 1 }
0x180b   :  { %1706 = vsyncpa [#allocation6 + $0x1], 1 }
0x180c   :  { %1707 = vsyncpa [#allocation11], 1 }
0x180d   :  { %1709 = vsyncpa [#allocation11 + $0x1], 1 }

</bundles_post_ra>
